<compile_context>
chip_gen: v7x
topology: tpu7x:2x2x1
jax: 0.10.0
libtpu: 0.0.40
codegen_flags: <defaults>
</compile_context>

<pallas_src>
import jax
import jax.numpy as jnp
from jax.experimental import pallas as pl
from jax.experimental.pallas import tpu as pltpu  # noqa: F401


def _round_up(x, m):
    return (x + m - 1) // m * m


# ----------------------------------------------------------------------------
# Parameter packing: everything the kernel needs in ONE (rows, 4H) f32 blob.
# Done once, outside jit -> the kernel sees exactly two operands (x, weights).
# ----------------------------------------------------------------------------
def pack_params(params):
    H = params["lstm"][0][1].shape[0]
    G = 4 * H
    pieces = []
    cur = 0

    def add(mat):
        nonlocal cur
        mat = jnp.asarray(mat, jnp.float32)
        r, c = mat.shape
        rp = _round_up(r, 8)                          # 8-sublane-aligned section
        buf = jnp.zeros((rp, G), jnp.float32).at[:r, :c].set(mat)
        pieces.append(buf)
        off = cur
        cur += rp
        return (off, rp)

    layer_offs = []
    for (wih_t, whh_t, b) in params["lstm"]:
        layer_offs.append((add(wih_t), add(whh_t), add(b)))
    fc_offs = (add(params["fc_w_t"]), add(params["fc_b"]))

    blob = jnp.concatenate(pieces, axis=0)            # (rows, 4H), rows % 8 == 0
    meta = {"layers": layer_offs, "fc": fc_offs, "H": H, "G": G}
    return blob, meta


# ----------------------------------------------------------------------------
# Fused Pallas kernel: all LSTM layers (wavefronted) + final FC, one call
# ----------------------------------------------------------------------------
def make_fused_lstm_kernel(meta, num_layers, T, Bp):
    H = meta["H"]
    G = meta["G"]
    layer_offs = meta["layers"]
    (fcw_off, fcw_rows), (fcb_off, _) = meta["fc"]

    def kernel(x_ref, w_ref, out_ref):
        f32 = jnp.float32

        # Hoisted per-lane constants: ONE tanh computes all four gates.
        #   i/f/o lanes: sigmoid(x) = 0.5 * tanh(0.5 * x) + 0.5
        #   g   lanes : tanh(x)
        lane = jax.lax.broadcasted_iota(jnp.int32, (1, G), 1)
        is_g = jnp.logical_and(lane >= 2 * H, lane < 3 * H)
        pre = jnp.where(is_g, 1.0, 0.5).astype(f32)       # (1, G)
        post_mul = pre
        post_add = jnp.where(is_g, 0.0, 0.5).astype(f32)   # (1, G)

        # Load all weights once from the packed blob (static 8-aligned slices).
        wih, whh, bias = [], [], []
        for l in range(num_layers):
            (oi, ri), (oh, rh), (ob, _) = layer_offs[l]
            wih.append(w_ref[oi:oi + ri, :])      # (in_p, 4H)
            whh.append(w_ref[oh:oh + rh, :])      # (H,    4H)
            bias.append(w_ref[ob:ob + 1, :])      # (1,    4H)
        fc_w = w_ref[fcw_off:fcw_off + fcw_rows, :]   # (H, 4H), cols [0,O) real
        fc_b = w_ref[fcb_off:fcb_off + 1, :]          # (1, 4H)

        # Hoisted layer-0 input projection for the whole sequence: one tall
        # (T*Bp, Fp) @ (Fp, 4H) matmul, off the serial h-dependency chain.
        gx0 = jnp.dot(x_ref[...], wih[0], preferred_element_type=f32) + bias[0]

        def cell(gates, c_prev):
            t_all = jnp.tanh(gates * pre)             # single EUP pass, all gates
            act = t_all * post_mul + post_add          # i/f/o -> sigmoid, g -> tanh
            i_g = act[:, 0 * H:1 * H]
            f_g = act[:, 1 * H:2 * H]
            g_g = act[:, 2 * H:3 * H]
            o_g = act[:, 3 * H:4 * H]
            c_new = f_g * c_prev + i_g * g_g
            h_new = o_g * jnp.tanh(c_new)
            return h_new, c_new

        h = [jnp.zeros((Bp, H), f32) for _ in range(num_layers)]
        c = [jnp.zeros((Bp, H), f32) for _ in range(num_layers)]

        # Wavefronted, fully-unrolled recurrence: layer l step t right after
        # layer l-1 step t -> dependent chain ~T+L instead of T*L, and the
        # adjacent layers' tiny matmuls are independent (scheduler overlaps).
        # TODO(synk): switch to lax.fori_loop(unroll=True) if T grows large.
        for t in range(T):
            for l in range(num_layers):
                if l == 0:
                    gx = gx0[t * Bp:(t + 1) * Bp, :]        # vreg-aligned slice
                else:
                    # Kept as a dot separate from the W_hh dot (not stacked),
                    # so the two MXU pushes per step window can overlap.
                    gx = jnp.dot(h[l - 1], wih[l],
                                 preferred_element_type=f32) + bias[l]
                gates = gx + jnp.dot(h[l], whh[l], preferred_element_type=f32)
                h[l], c[l] = cell(gates, c[l])

        # Final Linear on the top layer's last hidden state; produced as a
        # lane-dense (Bp, 4H) tile (unmasked store); wrapper slices (B, O).
        out_ref[...] = (jnp.dot(h[-1], fc_w, preferred_element_type=f32)
                        + fc_b)

    return kernel


# ----------------------------------------------------------------------------
# Wrapper
# ----------------------------------------------------------------------------
def make_forward(meta, *, seq_len, batch, input_size, output_size, num_layers):
    G = meta["G"]
    Bp = _round_up(max(batch, 1), 8)            # pad batch to f32 sublane count
    Fp = meta["layers"][0][0][1]                # padded layer-0 input width
    kernel = make_fused_lstm_kernel(meta, num_layers, seq_len, Bp)

    @jax.jit
    def forward(x, w_blob):
        # x: (B, T, F) batch-first, like the PyTorch module.
        # Single tiny XLA prologue: time-major + pad batch->Bp, features->Fp.
        # TODO(synk): fold this 256-byte rearrangement into the kernel if the
        # extra dispatch ever matters; kept outside to avoid an in-kernel
        # sublane scatter.
        x_tm = jnp.transpose(x, (1, 0, 2)).astype(jnp.float32)      # (T, B, F)
        x_p = jnp.zeros((seq_len, Bp, Fp), jnp.float32)
        x_p = x_p.at[:, :batch, :input_size].set(x_tm)
        x_flat = x_p.reshape(seq_len * Bp, Fp)

        out_p = pl.pallas_call(
            kernel,
            out_shape=jax.ShapeDtypeStruct((Bp, G), jnp.float32),
        )(x_flat, w_blob)
        return out_p[:batch, :output_size]

    return forward


# ----------------------------------------------------------------------------
# Deterministic parameter init (PyTorch-style uniform(-1/sqrt(H), 1/sqrt(H)))
# ----------------------------------------------------------------------------
def init_params(key, input_size, hidden_size, num_layers, output_size):
    H = hidden_size
    k = 1.0 / jnp.sqrt(jnp.float32(H))
    lstm_params = []
    for layer in range(num_layers):
        in_dim = input_size if layer == 0 else H
        key, k1, k2, k3, k4 = jax.random.split(key, 5)
        w_ih = jax.random.uniform(k1, (4 * H, in_dim), jnp.float32, -k, k)
        w_hh = jax.random.uniform(k2, (4 * H, H), jnp.float32, -k, k)
        b_ih = jax.random.uniform(k3, (4 * H,), jnp.float32, -k, k)
        b_hh = jax.random.uniform(k4, (4 * H,), jnp.float32, -k, k)
        lstm_params.append((w_ih.T, w_hh.T, (b_ih + b_hh).reshape(1, 4 * H)))
    key, k5, k6 = jax.random.split(key, 3)
    w_fc = jax.random.uniform(k5, (output_size, H), jnp.float32, -k, k)
    b_fc = jax.random.uniform(k6, (output_size,), jnp.float32, -k, k)
    return {
        "lstm": lstm_params,
        "fc_w_t": w_fc.T,
        "fc_b": b_fc.reshape(1, output_size),
    }


# ----------------------------------------------------------------------------
# Pure-JAX reference for numerical sanity check
# ----------------------------------------------------------------------------
def reference_forward(x, params):
    B = x.shape[0]
    seq = jnp.transpose(x, (1, 0, 2))  # (T, B, F)
    for (wih_t, whh_t, bias) in params["lstm"]:
        H = whh_t.shape[0]
        h = jnp.zeros((B, H), jnp.float32)
        c = jnp.zeros((B, H), jnp.float32)
        outs = []
        for t in range(seq.shape[0]):
            gates = seq[t] @ wih_t + h @ whh_t + bias
            i = jax.nn.sigmoid(gates[:, 0 * H:1 * H])
            f = jax.nn.sigmoid(gates[:, 1 * H:2 * H])
            g = jnp.tanh(gates[:, 2 * H:3 * H])
            o = jax.nn.sigmoid(gates[:, 3 * H:4 * H])
            c = f * c + i * g
            h = o * jnp.tanh(c)
            outs.append(h)
        seq = jnp.stack(outs, axis=0)
    return seq[-1] @ params["fc_w_t"] + params["fc_b"]


if __name__ == "__main__":
    # Small shapes implied by the module: (batch, seq, features)
    input_size, hidden_size, num_layers, output_size = 4, 32, 2, 1
    batch, seq_len = 2, 8

    key = jax.random.PRNGKey(0)
    key, xk = jax.random.split(key)
    x = jax.random.normal(xk, (batch, seq_len, input_size), jnp.float32)

    params = init_params(key, input_size, hidden_size, num_layers, output_size)
    w_blob, meta = pack_params(params)

    forward = make_forward(meta, seq_len=seq_len, batch=batch,
                           input_size=input_size, output_size=output_size,
                           num_layers=num_layers)

    out = jax.block_until_ready(forward(x, w_blob))

    ref = reference_forward(x, params)
    assert out.shape == (batch, output_size), out.shape
    assert jnp.allclose(out, ref, atol=1e-3, rtol=1e-3), (out, ref)

    print("KERNEL_OK")
</pallas_src>

<mosaic_0001>
module attributes {stable_mosaic.version = 11 : i64} {
  func.func @kernel(%arg0: memref<64x8xf32, #tpu.memory_space<vmem>>, %arg1: memref<160x128xf32, #tpu.memory_space<vmem>>, %arg2: memref<8x128xf32, #tpu.memory_space<vmem>>) attributes {dimension_semantics = [], scalar_prefetch = 0 : i64, scratch_operands = 0 : i64, tpu.core_type = #tpu.core_type<tc>} {
    %0 = tpu.iota {dimensions = array<i32: 1>} : vector<1x128xi32>
    %c64_i32 = arith.constant 64 : i32
    %1 = vector.broadcast %c64_i32 : i32 to vector<1x128xi32>
    %2 = arith.cmpi sge, %0, %1 : vector<1x128xi32>
    %c96_i32 = arith.constant 96 : i32
    %3 = vector.broadcast %c96_i32 : i32 to vector<1x128xi32>
    %4 = arith.cmpi slt, %0, %3 : vector<1x128xi32>
    %5 = arith.andi %2, %4 : vector<1x128xi1>
    %cst = arith.constant 1.000000e+00 : f32
    %cst_0 = arith.constant 5.000000e-01 : f32
    %6 = vector.broadcast %cst : f32 to vector<1x128xf32>
    %7 = vector.broadcast %cst_0 : f32 to vector<1x128xf32>
    %8 = arith.select %5, %6, %7 : vector<1x128xi1>, vector<1x128xf32>
    %cst_1 = arith.constant 0.000000e+00 : f32
    %cst_2 = arith.constant 5.000000e-01 : f32
    %9 = vector.broadcast %cst_1 : f32 to vector<1x128xf32>
    %10 = vector.broadcast %cst_2 : f32 to vector<1x128xf32>
    %11 = arith.select %5, %9, %10 : vector<1x128xi1>, vector<1x128xf32>
    %c0 = arith.constant 0 : index
    %c0_3 = arith.constant 0 : index
    %12 = vector.load %arg1[%c0, %c0_3] : memref<160x128xf32, #tpu.memory_space<vmem>>, vector<8x128xf32>
    %c8 = arith.constant 8 : index
    %c0_4 = arith.constant 0 : index
    %13 = vector.load %arg1[%c8, %c0_4] : memref<160x128xf32, #tpu.memory_space<vmem>>, vector<32x128xf32>
    %c40 = arith.constant 40 : index
    %c0_5 = arith.constant 0 : index
    %14 = vector.load %arg1[%c40, %c0_5] : memref<160x128xf32, #tpu.memory_space<vmem>>, vector<1x128xf32>
    %c48 = arith.constant 48 : index
    %c0_6 = arith.constant 0 : index
    %15 = vector.load %arg1[%c48, %c0_6] : memref<160x128xf32, #tpu.memory_space<vmem>>, vector<32x128xf32>
    %c80 = arith.constant 80 : index
    %c0_7 = arith.constant 0 : index
    %16 = vector.load %arg1[%c80, %c0_7] : memref<160x128xf32, #tpu.memory_space<vmem>>, vector<32x128xf32>
    %c112 = arith.constant 112 : index
    %c0_8 = arith.constant 0 : index
    %17 = vector.load %arg1[%c112, %c0_8] : memref<160x128xf32, #tpu.memory_space<vmem>>, vector<1x128xf32>
    %c120 = arith.constant 120 : index
    %c0_9 = arith.constant 0 : index
    %18 = vector.load %arg1[%c120, %c0_9] : memref<160x128xf32, #tpu.memory_space<vmem>>, vector<32x128xf32>
    %c152 = arith.constant 152 : index
    %c0_10 = arith.constant 0 : index
    %19 = vector.load %arg1[%c152, %c0_10] : memref<160x128xf32, #tpu.memory_space<vmem>>, vector<1x128xf32>
    %c0_11 = arith.constant 0 : index
    %c0_12 = arith.constant 0 : index
    %20 = vector.load %arg0[%c0_11, %c0_12] : memref<64x8xf32, #tpu.memory_space<vmem>>, vector<64x8xf32>
    %cst_13 = arith.constant dense<0.000000e+00> : vector<64x128xf32>
    %21 = tpu.matmul %20, %12, %cst_13 {dimension_numbers = #tpu.dot_dimension_numbers<[1], [0], [0], [1], [0, 0, 1, 1], [], []>} : vector<64x8xf32>, vector<8x128xf32>, vector<64x128xf32> -> vector<64x128xf32>
    %22 = vector.broadcast %14 : vector<1x128xf32> to vector<64x128xf32>
    %23 = arith.addf %21, %22 : vector<64x128xf32>
    %cst_14 = arith.constant 0.000000e+00 : f32
    %24 = vector.broadcast %cst_14 : f32 to vector<8x32xf32>
    %cst_15 = arith.constant 0.000000e+00 : f32
    %25 = vector.broadcast %cst_15 : f32 to vector<8x32xf32>
    %cst_16 = arith.constant 0.000000e+00 : f32
    %26 = vector.broadcast %cst_16 : f32 to vector<8x32xf32>
    %cst_17 = arith.constant 0.000000e+00 : f32
    %27 = vector.broadcast %cst_17 : f32 to vector<8x32xf32>
    %28 = vector.extract_strided_slice %23 {offsets = [0, 0], sizes = [8, 128], strides = [1, 1]} : vector<64x128xf32> to vector<8x128xf32>
    %cst_18 = arith.constant dense<0.000000e+00> : vector<8x128xf32>
    %29 = tpu.matmul %24, %13, %cst_18 {dimension_numbers = #tpu.dot_dimension_numbers<[1], [0], [0], [1], [0, 0, 1, 1], [], []>} : vector<8x32xf32>, vector<32x128xf32>, vector<8x128xf32> -> vector<8x128xf32>
    %30 = arith.addf %28, %29 : vector<8x128xf32>
    %31 = vector.broadcast %8 : vector<1x128xf32> to vector<8x128xf32>
    %32 = arith.mulf %30, %31 : vector<8x128xf32>
    %33 = math.tanh %32 : vector<8x128xf32>
    %34 = vector.broadcast %8 : vector<1x128xf32> to vector<8x128xf32>
    %35 = arith.mulf %33, %34 : vector<8x128xf32>
    %36 = vector.broadcast %11 : vector<1x128xf32> to vector<8x128xf32>
    %37 = arith.addf %35, %36 : vector<8x128xf32>
    %38 = vector.extract_strided_slice %37 {offsets = [0, 0], sizes = [8, 32], strides = [1, 1]} : vector<8x128xf32> to vector<8x32xf32>
    %39 = vector.extract_strided_slice %37 {offsets = [0, 32], sizes = [8, 32], strides = [1, 1]} : vector<8x128xf32> to vector<8x32xf32>
    %40 = vector.extract_strided_slice %37 {offsets = [0, 64], sizes = [8, 32], strides = [1, 1]} : vector<8x128xf32> to vector<8x32xf32>
    %41 = vector.extract_strided_slice %37 {offsets = [0, 96], sizes = [8, 32], strides = [1, 1]} : vector<8x128xf32> to vector<8x32xf32>
    %42 = arith.mulf %39, %26 : vector<8x32xf32>
    %43 = arith.mulf %38, %40 : vector<8x32xf32>
    %44 = arith.addf %42, %43 : vector<8x32xf32>
    %45 = math.tanh %44 : vector<8x32xf32>
    %46 = arith.mulf %41, %45 : vector<8x32xf32>
    %cst_19 = arith.constant dense<0.000000e+00> : vector<8x128xf32>
    %47 = tpu.matmul %46, %15, %cst_19 {dimension_numbers = #tpu.dot_dimension_numbers<[1], [0], [0], [1], [0, 0, 1, 1], [], []>} : vector<8x32xf32>, vector<32x128xf32>, vector<8x128xf32> -> vector<8x128xf32>
    %48 = vector.broadcast %17 : vector<1x128xf32> to vector<8x128xf32>
    %49 = arith.addf %47, %48 : vector<8x128xf32>
    %cst_20 = arith.constant dense<0.000000e+00> : vector<8x128xf32>
    %50 = tpu.matmul %25, %16, %cst_20 {dimension_numbers = #tpu.dot_dimension_numbers<[1], [0], [0], [1], [0, 0, 1, 1], [], []>} : vector<8x32xf32>, vector<32x128xf32>, vector<8x128xf32> -> vector<8x128xf32>
    %51 = arith.addf %49, %50 : vector<8x128xf32>
    %52 = vector.broadcast %8 : vector<1x128xf32> to vector<8x128xf32>
    %53 = arith.mulf %51, %52 : vector<8x128xf32>
    %54 = math.tanh %53 : vector<8x128xf32>
    %55 = vector.broadcast %8 : vector<1x128xf32> to vector<8x128xf32>
    %56 = arith.mulf %54, %55 : vector<8x128xf32>
    %57 = vector.broadcast %11 : vector<1x128xf32> to vector<8x128xf32>
    %58 = arith.addf %56, %57 : vector<8x128xf32>
    %59 = vector.extract_strided_slice %58 {offsets = [0, 0], sizes = [8, 32], strides = [1, 1]} : vector<8x128xf32> to vector<8x32xf32>
    %60 = vector.extract_strided_slice %58 {offsets = [0, 32], sizes = [8, 32], strides = [1, 1]} : vector<8x128xf32> to vector<8x32xf32>
    %61 = vector.extract_strided_slice %58 {offsets = [0, 64], sizes = [8, 32], strides = [1, 1]} : vector<8x128xf32> to vector<8x32xf32>
    %62 = vector.extract_strided_slice %58 {offsets = [0, 96], sizes = [8, 32], strides = [1, 1]} : vector<8x128xf32> to vector<8x32xf32>
    %63 = arith.mulf %60, %27 : vector<8x32xf32>
    %64 = arith.mulf %59, %61 : vector<8x32xf32>
    %65 = arith.addf %63, %64 : vector<8x32xf32>
    %66 = math.tanh %65 : vector<8x32xf32>
    %67 = arith.mulf %62, %66 : vector<8x32xf32>
    %68 = vector.extract_strided_slice %23 {offsets = [8, 0], sizes = [8, 128], strides = [1, 1]} : vector<64x128xf32> to vector<8x128xf32>
    %cst_21 = arith.constant dense<0.000000e+00> : vector<8x128xf32>
    %69 = tpu.matmul %46, %13, %cst_21 {dimension_numbers = #tpu.dot_dimension_numbers<[1], [0], [0], [1], [0, 0, 1, 1], [], []>} : vector<8x32xf32>, vector<32x128xf32>, vector<8x128xf32> -> vector<8x128xf32>
    %70 = arith.addf %68, %69 : vector<8x128xf32>
    %71 = vector.broadcast %8 : vector<1x128xf32> to vector<8x128xf32>
    %72 = arith.mulf %70, %71 : vector<8x128xf32>
    %73 = math.tanh %72 : vector<8x128xf32>
    %74 = vector.broadcast %8 : vector<1x128xf32> to vector<8x128xf32>
    %75 = arith.mulf %73, %74 : vector<8x128xf32>
    %76 = vector.broadcast %11 : vector<1x128xf32> to vector<8x128xf32>
    %77 = arith.addf %75, %76 : vector<8x128xf32>
    %78 = vector.extract_strided_slice %77 {offsets = [0, 0], sizes = [8, 32], strides = [1, 1]} : vector<8x128xf32> to vector<8x32xf32>
    %79 = vector.extract_strided_slice %77 {offsets = [0, 32], sizes = [8, 32], strides = [1, 1]} : vector<8x128xf32> to vector<8x32xf32>
    %80 = vector.extract_strided_slice %77 {offsets = [0, 64], sizes = [8, 32], strides = [1, 1]} : vector<8x128xf32> to vector<8x32xf32>
    %81 = vector.extract_strided_slice %77 {offsets = [0, 96], sizes = [8, 32], strides = [1, 1]} : vector<8x128xf32> to vector<8x32xf32>
    %82 = arith.mulf %79, %44 : vector<8x32xf32>
    %83 = arith.mulf %78, %80 : vector<8x32xf32>
    %84 = arith.addf %82, %83 : vector<8x32xf32>
    %85 = math.tanh %84 : vector<8x32xf32>
    %86 = arith.mulf %81, %85 : vector<8x32xf32>
    %cst_22 = arith.constant dense<0.000000e+00> : vector<8x128xf32>
    %87 = tpu.matmul %86, %15, %cst_22 {dimension_numbers = #tpu.dot_dimension_numbers<[1], [0], [0], [1], [0, 0, 1, 1], [], []>} : vector<8x32xf32>, vector<32x128xf32>, vector<8x128xf32> -> vector<8x128xf32>
    %88 = vector.broadcast %17 : vector<1x128xf32> to vector<8x128xf32>
    %89 = arith.addf %87, %88 : vector<8x128xf32>
    %cst_23 = arith.constant dense<0.000000e+00> : vector<8x128xf32>
    %90 = tpu.matmul %67, %16, %cst_23 {dimension_numbers = #tpu.dot_dimension_numbers<[1], [0], [0], [1], [0, 0, 1, 1], [], []>} : vector<8x32xf32>, vector<32x128xf32>, vector<8x128xf32> -> vector<8x128xf32>
    %91 = arith.addf %89, %90 : vector<8x128xf32>
    %92 = vector.broadcast %8 : vector<1x128xf32> to vector<8x128xf32>
    %93 = arith.mulf %91, %92 : vector<8x128xf32>
    %94 = math.tanh %93 : vector<8x128xf32>
    %95 = vector.broadcast %8 : vector<1x128xf32> to vector<8x128xf32>
    %96 = arith.mulf %94, %95 : vector<8x128xf32>
    %97 = vector.broadcast %11 : vector<1x128xf32> to vector<8x128xf32>
    %98 = arith.addf %96, %97 : vector<8x128xf32>
    %99 = vector.extract_strided_slice %98 {offsets = [0, 0], sizes = [8, 32], strides = [1, 1]} : vector<8x128xf32> to vector<8x32xf32>
    %100 = vector.extract_strided_slice %98 {offsets = [0, 32], sizes = [8, 32], strides = [1, 1]} : vector<8x128xf32> to vector<8x32xf32>
    %101 = vector.extract_strided_slice %98 {offsets = [0, 64], sizes = [8, 32], strides = [1, 1]} : vector<8x128xf32> to vector<8x32xf32>
    %102 = vector.extract_strided_slice %98 {offsets = [0, 96], sizes = [8, 32], strides = [1, 1]} : vector<8x128xf32> to vector<8x32xf32>
    %103 = arith.mulf %100, %65 : vector<8x32xf32>
    %104 = arith.mulf %99, %101 : vector<8x32xf32>
    %105 = arith.addf %103, %104 : vector<8x32xf32>
    %106 = math.tanh %105 : vector<8x32xf32>
    %107 = arith.mulf %102, %106 : vector<8x32xf32>
    %108 = vector.extract_strided_slice %23 {offsets = [16, 0], sizes = [8, 128], strides = [1, 1]} : vector<64x128xf32> to vector<8x128xf32>
    %cst_24 = arith.constant dense<0.000000e+00> : vector<8x128xf32>
    %109 = tpu.matmul %86, %13, %cst_24 {dimension_numbers = #tpu.dot_dimension_numbers<[1], [0], [0], [1], [0, 0, 1, 1], [], []>} : vector<8x32xf32>, vector<32x128xf32>, vector<8x128xf32> -> vector<8x128xf32>
    %110 = arith.addf %108, %109 : vector<8x128xf32>
    %111 = vector.broadcast %8 : vector<1x128xf32> to vector<8x128xf32>
    %112 = arith.mulf %110, %111 : vector<8x128xf32>
    %113 = math.tanh %112 : vector<8x128xf32>
    %114 = vector.broadcast %8 : vector<1x128xf32> to vector<8x128xf32>
    %115 = arith.mulf %113, %114 : vector<8x128xf32>
    %116 = vector.broadcast %11 : vector<1x128xf32> to vector<8x128xf32>
    %117 = arith.addf %115, %116 : vector<8x128xf32>
    %118 = vector.extract_strided_slice %117 {offsets = [0, 0], sizes = [8, 32], strides = [1, 1]} : vector<8x128xf32> to vector<8x32xf32>
    %119 = vector.extract_strided_slice %117 {offsets = [0, 32], sizes = [8, 32], strides = [1, 1]} : vector<8x128xf32> to vector<8x32xf32>
    %120 = vector.extract_strided_slice %117 {offsets = [0, 64], sizes = [8, 32], strides = [1, 1]} : vector<8x128xf32> to vector<8x32xf32>
    %121 = vector.extract_strided_slice %117 {offsets = [0, 96], sizes = [8, 32], strides = [1, 1]} : vector<8x128xf32> to vector<8x32xf32>
    %122 = arith.mulf %119, %84 : vector<8x32xf32>
    %123 = arith.mulf %118, %120 : vector<8x32xf32>
    %124 = arith.addf %122, %123 : vector<8x32xf32>
    %125 = math.tanh %124 : vector<8x32xf32>
    %126 = arith.mulf %121, %125 : vector<8x32xf32>
    %cst_25 = arith.constant dense<0.000000e+00> : vector<8x128xf32>
    %127 = tpu.matmul %126, %15, %cst_25 {dimension_numbers = #tpu.dot_dimension_numbers<[1], [0], [0], [1], [0, 0, 1, 1], [], []>} : vector<8x32xf32>, vector<32x128xf32>, vector<8x128xf32> -> vector<8x128xf32>
    %128 = vector.broadcast %17 : vector<1x128xf32> to vector<8x128xf32>
    %129 = arith.addf %127, %128 : vector<8x128xf32>
    %cst_26 = arith.constant dense<0.000000e+00> : vector<8x128xf32>
    %130 = tpu.matmul %107, %16, %cst_26 {dimension_numbers = #tpu.dot_dimension_numbers<[1], [0], [0], [1], [0, 0, 1, 1], [], []>} : vector<8x32xf32>, vector<32x128xf32>, vector<8x128xf32> -> vector<8x128xf32>
    %131 = arith.addf %129, %130 : vector<8x128xf32>
    %132 = vector.broadcast %8 : vector<1x128xf32> to vector<8x128xf32>
    %133 = arith.mulf %131, %132 : vector<8x128xf32>
    %134 = math.tanh %133 : vector<8x128xf32>
    %135 = vector.broadcast %8 : vector<1x128xf32> to vector<8x128xf32>
    %136 = arith.mulf %134, %135 : vector<8x128xf32>
    %137 = vector.broadcast %11 : vector<1x128xf32> to vector<8x128xf32>
    %138 = arith.addf %136, %137 : vector<8x128xf32>
    %139 = vector.extract_strided_slice %138 {offsets = [0, 0], sizes = [8, 32], strides = [1, 1]} : vector<8x128xf32> to vector<8x32xf32>
    %140 = vector.extract_strided_slice %138 {offsets = [0, 32], sizes = [8, 32], strides = [1, 1]} : vector<8x128xf32> to vector<8x32xf32>
    %141 = vector.extract_strided_slice %138 {offsets = [0, 64], sizes = [8, 32], strides = [1, 1]} : vector<8x128xf32> to vector<8x32xf32>
    %142 = vector.extract_strided_slice %138 {offsets = [0, 96], sizes = [8, 32], strides = [1, 1]} : vector<8x128xf32> to vector<8x32xf32>
    %143 = arith.mulf %140, %105 : vector<8x32xf32>
    %144 = arith.mulf %139, %141 : vector<8x32xf32>
    %145 = arith.addf %143, %144 : vector<8x32xf32>
    %146 = math.tanh %145 : vector<8x32xf32>
    %147 = arith.mulf %142, %146 : vector<8x32xf32>
    %148 = vector.extract_strided_slice %23 {offsets = [24, 0], sizes = [8, 128], strides = [1, 1]} : vector<64x128xf32> to vector<8x128xf32>
    %cst_27 = arith.constant dense<0.000000e+00> : vector<8x128xf32>
    %149 = tpu.matmul %126, %13, %cst_27 {dimension_numbers = #tpu.dot_dimension_numbers<[1], [0], [0], [1], [0, 0, 1, 1], [], []>} : vector<8x32xf32>, vector<32x128xf32>, vector<8x128xf32> -> vector<8x128xf32>
    %150 = arith.addf %148, %149 : vector<8x128xf32>
    %151 = vector.broadcast %8 : vector<1x128xf32> to vector<8x128xf32>
    %152 = arith.mulf %150, %151 : vector<8x128xf32>
    %153 = math.tanh %152 : vector<8x128xf32>
    %154 = vector.broadcast %8 : vector<1x128xf32> to vector<8x128xf32>
    %155 = arith.mulf %153, %154 : vector<8x128xf32>
    %156 = vector.broadcast %11 : vector<1x128xf32> to vector<8x128xf32>
    %157 = arith.addf %155, %156 : vector<8x128xf32>
    %158 = vector.extract_strided_slice %157 {offsets = [0, 0], sizes = [8, 32], strides = [1, 1]} : vector<8x128xf32> to vector<8x32xf32>
    %159 = vector.extract_strided_slice %157 {offsets = [0, 32], sizes = [8, 32], strides = [1, 1]} : vector<8x128xf32> to vector<8x32xf32>
    %160 = vector.extract_strided_slice %157 {offsets = [0, 64], sizes = [8, 32], strides = [1, 1]} : vector<8x128xf32> to vector<8x32xf32>
    %161 = vector.extract_strided_slice %157 {offsets = [0, 96], sizes = [8, 32], strides = [1, 1]} : vector<8x128xf32> to vector<8x32xf32>
    %162 = arith.mulf %159, %124 : vector<8x32xf32>
    %163 = arith.mulf %158, %160 : vector<8x32xf32>
    %164 = arith.addf %162, %163 : vector<8x32xf32>
    %165 = math.tanh %164 : vector<8x32xf32>
    %166 = arith.mulf %161, %165 : vector<8x32xf32>
    %cst_28 = arith.constant dense<0.000000e+00> : vector<8x128xf32>
    %167 = tpu.matmul %166, %15, %cst_28 {dimension_numbers = #tpu.dot_dimension_numbers<[1], [0], [0], [1], [0, 0, 1, 1], [], []>} : vector<8x32xf32>, vector<32x128xf32>, vector<8x128xf32> -> vector<8x128xf32>
    %168 = vector.broadcast %17 : vector<1x128xf32> to vector<8x128xf32>
    %169 = arith.addf %167, %168 : vector<8x128xf32>
    %cst_29 = arith.constant dense<0.000000e+00> : vector<8x128xf32>
    %170 = tpu.matmul %147, %16, %cst_29 {dimension_numbers = #tpu.dot_dimension_numbers<[1], [0], [0], [1], [0, 0, 1, 1], [], []>} : vector<8x32xf32>, vector<32x128xf32>, vector<8x128xf32> -> vector<8x128xf32>
    %171 = arith.addf %169, %170 : vector<8x128xf32>
    %172 = vector.broadcast %8 : vector<1x128xf32> to vector<8x128xf32>
    %173 = arith.mulf %171, %172 : vector<8x128xf32>
    %174 = math.tanh %173 : vector<8x128xf32>
    %175 = vector.broadcast %8 : vector<1x128xf32> to vector<8x128xf32>
    %176 = arith.mulf %174, %175 : vector<8x128xf32>
    %177 = vector.broadcast %11 : vector<1x128xf32> to vector<8x128xf32>
    %178 = arith.addf %176, %177 : vector<8x128xf32>
    %179 = vector.extract_strided_slice %178 {offsets = [0, 0], sizes = [8, 32], strides = [1, 1]} : vector<8x128xf32> to vector<8x32xf32>
    %180 = vector.extract_strided_slice %178 {offsets = [0, 32], sizes = [8, 32], strides = [1, 1]} : vector<8x128xf32> to vector<8x32xf32>
    %181 = vector.extract_strided_slice %178 {offsets = [0, 64], sizes = [8, 32], strides = [1, 1]} : vector<8x128xf32> to vector<8x32xf32>
    %182 = vector.extract_strided_slice %178 {offsets = [0, 96], sizes = [8, 32], strides = [1, 1]} : vector<8x128xf32> to vector<8x32xf32>
    %183 = arith.mulf %180, %145 : vector<8x32xf32>
    %184 = arith.mulf %179, %181 : vector<8x32xf32>
    %185 = arith.addf %183, %184 : vector<8x32xf32>
    %186 = math.tanh %185 : vector<8x32xf32>
    %187 = arith.mulf %182, %186 : vector<8x32xf32>
    %188 = vector.extract_strided_slice %23 {offsets = [32, 0], sizes = [8, 128], strides = [1, 1]} : vector<64x128xf32> to vector<8x128xf32>
    %cst_30 = arith.constant dense<0.000000e+00> : vector<8x128xf32>
    %189 = tpu.matmul %166, %13, %cst_30 {dimension_numbers = #tpu.dot_dimension_numbers<[1], [0], [0], [1], [0, 0, 1, 1], [], []>} : vector<8x32xf32>, vector<32x128xf32>, vector<8x128xf32> -> vector<8x128xf32>
    %190 = arith.addf %188, %189 : vector<8x128xf32>
    %191 = vector.broadcast %8 : vector<1x128xf32> to vector<8x128xf32>
    %192 = arith.mulf %190, %191 : vector<8x128xf32>
    %193 = math.tanh %192 : vector<8x128xf32>
    %194 = vector.broadcast %8 : vector<1x128xf32> to vector<8x128xf32>
    %195 = arith.mulf %193, %194 : vector<8x128xf32>
    %196 = vector.broadcast %11 : vector<1x128xf32> to vector<8x128xf32>
    %197 = arith.addf %195, %196 : vector<8x128xf32>
    %198 = vector.extract_strided_slice %197 {offsets = [0, 0], sizes = [8, 32], strides = [1, 1]} : vector<8x128xf32> to vector<8x32xf32>
    %199 = vector.extract_strided_slice %197 {offsets = [0, 32], sizes = [8, 32], strides = [1, 1]} : vector<8x128xf32> to vector<8x32xf32>
    %200 = vector.extract_strided_slice %197 {offsets = [0, 64], sizes = [8, 32], strides = [1, 1]} : vector<8x128xf32> to vector<8x32xf32>
    %201 = vector.extract_strided_slice %197 {offsets = [0, 96], sizes = [8, 32], strides = [1, 1]} : vector<8x128xf32> to vector<8x32xf32>
    %202 = arith.mulf %199, %164 : vector<8x32xf32>
    %203 = arith.mulf %198, %200 : vector<8x32xf32>
    %204 = arith.addf %202, %203 : vector<8x32xf32>
    %205 = math.tanh %204 : vector<8x32xf32>
    %206 = arith.mulf %201, %205 : vector<8x32xf32>
    %cst_31 = arith.constant dense<0.000000e+00> : vector<8x128xf32>
    %207 = tpu.matmul %206, %15, %cst_31 {dimension_numbers = #tpu.dot_dimension_numbers<[1], [0], [0], [1], [0, 0, 1, 1], [], []>} : vector<8x32xf32>, vector<32x128xf32>, vector<8x128xf32> -> vector<8x128xf32>
    %208 = vector.broadcast %17 : vector<1x128xf32> to vector<8x128xf32>
    %209 = arith.addf %207, %208 : vector<8x128xf32>
    %cst_32 = arith.constant dense<0.000000e+00> : vector<8x128xf32>
    %210 = tpu.matmul %187, %16, %cst_32 {dimension_numbers = #tpu.dot_dimension_numbers<[1], [0], [0], [1], [0, 0, 1, 1], [], []>} : vector<8x32xf32>, vector<32x128xf32>, vector<8x128xf32> -> vector<8x128xf32>
    %211 = arith.addf %209, %210 : vector<8x128xf32>
    %212 = vector.broadcast %8 : vector<1x128xf32> to vector<8x128xf32>
    %213 = arith.mulf %211, %212 : vector<8x128xf32>
    %214 = math.tanh %213 : vector<8x128xf32>
    %215 = vector.broadcast %8 : vector<1x128xf32> to vector<8x128xf32>
    %216 = arith.mulf %214, %215 : vector<8x128xf32>
    %217 = vector.broadcast %11 : vector<1x128xf32> to vector<8x128xf32>
    %218 = arith.addf %216, %217 : vector<8x128xf32>
    %219 = vector.extract_strided_slice %218 {offsets = [0, 0], sizes = [8, 32], strides = [1, 1]} : vector<8x128xf32> to vector<8x32xf32>
    %220 = vector.extract_strided_slice %218 {offsets = [0, 32], sizes = [8, 32], strides = [1, 1]} : vector<8x128xf32> to vector<8x32xf32>
    %221 = vector.extract_strided_slice %218 {offsets = [0, 64], sizes = [8, 32], strides = [1, 1]} : vector<8x128xf32> to vector<8x32xf32>
    %222 = vector.extract_strided_slice %218 {offsets = [0, 96], sizes = [8, 32], strides = [1, 1]} : vector<8x128xf32> to vector<8x32xf32>
    %223 = arith.mulf %220, %185 : vector<8x32xf32>
    %224 = arith.mulf %219, %221 : vector<8x32xf32>
    %225 = arith.addf %223, %224 : vector<8x32xf32>
    %226 = math.tanh %225 : vector<8x32xf32>
    %227 = arith.mulf %222, %226 : vector<8x32xf32>
    %228 = vector.extract_strided_slice %23 {offsets = [40, 0], sizes = [8, 128], strides = [1, 1]} : vector<64x128xf32> to vector<8x128xf32>
    %cst_33 = arith.constant dense<0.000000e+00> : vector<8x128xf32>
    %229 = tpu.matmul %206, %13, %cst_33 {dimension_numbers = #tpu.dot_dimension_numbers<[1], [0], [0], [1], [0, 0, 1, 1], [], []>} : vector<8x32xf32>, vector<32x128xf32>, vector<8x128xf32> -> vector<8x128xf32>
    %230 = arith.addf %228, %229 : vector<8x128xf32>
    %231 = vector.broadcast %8 : vector<1x128xf32> to vector<8x128xf32>
    %232 = arith.mulf %230, %231 : vector<8x128xf32>
    %233 = math.tanh %232 : vector<8x128xf32>
    %234 = vector.broadcast %8 : vector<1x128xf32> to vector<8x128xf32>
    %235 = arith.mulf %233, %234 : vector<8x128xf32>
    %236 = vector.broadcast %11 : vector<1x128xf32> to vector<8x128xf32>
    %237 = arith.addf %235, %236 : vector<8x128xf32>
    %238 = vector.extract_strided_slice %237 {offsets = [0, 0], sizes = [8, 32], strides = [1, 1]} : vector<8x128xf32> to vector<8x32xf32>
    %239 = vector.extract_strided_slice %237 {offsets = [0, 32], sizes = [8, 32], strides = [1, 1]} : vector<8x128xf32> to vector<8x32xf32>
    %240 = vector.extract_strided_slice %237 {offsets = [0, 64], sizes = [8, 32], strides = [1, 1]} : vector<8x128xf32> to vector<8x32xf32>
    %241 = vector.extract_strided_slice %237 {offsets = [0, 96], sizes = [8, 32], strides = [1, 1]} : vector<8x128xf32> to vector<8x32xf32>
    %242 = arith.mulf %239, %204 : vector<8x32xf32>
    %243 = arith.mulf %238, %240 : vector<8x32xf32>
    %244 = arith.addf %242, %243 : vector<8x32xf32>
    %245 = math.tanh %244 : vector<8x32xf32>
    %246 = arith.mulf %241, %245 : vector<8x32xf32>
    %cst_34 = arith.constant dense<0.000000e+00> : vector<8x128xf32>
    %247 = tpu.matmul %246, %15, %cst_34 {dimension_numbers = #tpu.dot_dimension_numbers<[1], [0], [0], [1], [0, 0, 1, 1], [], []>} : vector<8x32xf32>, vector<32x128xf32>, vector<8x128xf32> -> vector<8x128xf32>
    %248 = vector.broadcast %17 : vector<1x128xf32> to vector<8x128xf32>
    %249 = arith.addf %247, %248 : vector<8x128xf32>
    %cst_35 = arith.constant dense<0.000000e+00> : vector<8x128xf32>
    %250 = tpu.matmul %227, %16, %cst_35 {dimension_numbers = #tpu.dot_dimension_numbers<[1], [0], [0], [1], [0, 0, 1, 1], [], []>} : vector<8x32xf32>, vector<32x128xf32>, vector<8x128xf32> -> vector<8x128xf32>
    %251 = arith.addf %249, %250 : vector<8x128xf32>
    %252 = vector.broadcast %8 : vector<1x128xf32> to vector<8x128xf32>
    %253 = arith.mulf %251, %252 : vector<8x128xf32>
    %254 = math.tanh %253 : vector<8x128xf32>
    %255 = vector.broadcast %8 : vector<1x128xf32> to vector<8x128xf32>
    %256 = arith.mulf %254, %255 : vector<8x128xf32>
    %257 = vector.broadcast %11 : vector<1x128xf32> to vector<8x128xf32>
    %258 = arith.addf %256, %257 : vector<8x128xf32>
    %259 = vector.extract_strided_slice %258 {offsets = [0, 0], sizes = [8, 32], strides = [1, 1]} : vector<8x128xf32> to vector<8x32xf32>
    %260 = vector.extract_strided_slice %258 {offsets = [0, 32], sizes = [8, 32], strides = [1, 1]} : vector<8x128xf32> to vector<8x32xf32>
    %261 = vector.extract_strided_slice %258 {offsets = [0, 64], sizes = [8, 32], strides = [1, 1]} : vector<8x128xf32> to vector<8x32xf32>
    %262 = vector.extract_strided_slice %258 {offsets = [0, 96], sizes = [8, 32], strides = [1, 1]} : vector<8x128xf32> to vector<8x32xf32>
    %263 = arith.mulf %260, %225 : vector<8x32xf32>
    %264 = arith.mulf %259, %261 : vector<8x32xf32>
    %265 = arith.addf %263, %264 : vector<8x32xf32>
    %266 = math.tanh %265 : vector<8x32xf32>
    %267 = arith.mulf %262, %266 : vector<8x32xf32>
    %268 = vector.extract_strided_slice %23 {offsets = [48, 0], sizes = [8, 128], strides = [1, 1]} : vector<64x128xf32> to vector<8x128xf32>
    %cst_36 = arith.constant dense<0.000000e+00> : vector<8x128xf32>
    %269 = tpu.matmul %246, %13, %cst_36 {dimension_numbers = #tpu.dot_dimension_numbers<[1], [0], [0], [1], [0, 0, 1, 1], [], []>} : vector<8x32xf32>, vector<32x128xf32>, vector<8x128xf32> -> vector<8x128xf32>
    %270 = arith.addf %268, %269 : vector<8x128xf32>
    %271 = vector.broadcast %8 : vector<1x128xf32> to vector<8x128xf32>
    %272 = arith.mulf %270, %271 : vector<8x128xf32>
    %273 = math.tanh %272 : vector<8x128xf32>
    %274 = vector.broadcast %8 : vector<1x128xf32> to vector<8x128xf32>
    %275 = arith.mulf %273, %274 : vector<8x128xf32>
    %276 = vector.broadcast %11 : vector<1x128xf32> to vector<8x128xf32>
    %277 = arith.addf %275, %276 : vector<8x128xf32>
    %278 = vector.extract_strided_slice %277 {offsets = [0, 0], sizes = [8, 32], strides = [1, 1]} : vector<8x128xf32> to vector<8x32xf32>
    %279 = vector.extract_strided_slice %277 {offsets = [0, 32], sizes = [8, 32], strides = [1, 1]} : vector<8x128xf32> to vector<8x32xf32>
    %280 = vector.extract_strided_slice %277 {offsets = [0, 64], sizes = [8, 32], strides = [1, 1]} : vector<8x128xf32> to vector<8x32xf32>
    %281 = vector.extract_strided_slice %277 {offsets = [0, 96], sizes = [8, 32], strides = [1, 1]} : vector<8x128xf32> to vector<8x32xf32>
    %282 = arith.mulf %279, %244 : vector<8x32xf32>
    %283 = arith.mulf %278, %280 : vector<8x32xf32>
    %284 = arith.addf %282, %283 : vector<8x32xf32>
    %285 = math.tanh %284 : vector<8x32xf32>
    %286 = arith.mulf %281, %285 : vector<8x32xf32>
    %cst_37 = arith.constant dense<0.000000e+00> : vector<8x128xf32>
    %287 = tpu.matmul %286, %15, %cst_37 {dimension_numbers = #tpu.dot_dimension_numbers<[1], [0], [0], [1], [0, 0, 1, 1], [], []>} : vector<8x32xf32>, vector<32x128xf32>, vector<8x128xf32> -> vector<8x128xf32>
    %288 = vector.broadcast %17 : vector<1x128xf32> to vector<8x128xf32>
    %289 = arith.addf %287, %288 : vector<8x128xf32>
    %cst_38 = arith.constant dense<0.000000e+00> : vector<8x128xf32>
    %290 = tpu.matmul %267, %16, %cst_38 {dimension_numbers = #tpu.dot_dimension_numbers<[1], [0], [0], [1], [0, 0, 1, 1], [], []>} : vector<8x32xf32>, vector<32x128xf32>, vector<8x128xf32> -> vector<8x128xf32>
    %291 = arith.addf %289, %290 : vector<8x128xf32>
    %292 = vector.broadcast %8 : vector<1x128xf32> to vector<8x128xf32>
    %293 = arith.mulf %291, %292 : vector<8x128xf32>
    %294 = math.tanh %293 : vector<8x128xf32>
    %295 = vector.broadcast %8 : vector<1x128xf32> to vector<8x128xf32>
    %296 = arith.mulf %294, %295 : vector<8x128xf32>
    %297 = vector.broadcast %11 : vector<1x128xf32> to vector<8x128xf32>
    %298 = arith.addf %296, %297 : vector<8x128xf32>
    %299 = vector.extract_strided_slice %298 {offsets = [0, 0], sizes = [8, 32], strides = [1, 1]} : vector<8x128xf32> to vector<8x32xf32>
    %300 = vector.extract_strided_slice %298 {offsets = [0, 32], sizes = [8, 32], strides = [1, 1]} : vector<8x128xf32> to vector<8x32xf32>
    %301 = vector.extract_strided_slice %298 {offsets = [0, 64], sizes = [8, 32], strides = [1, 1]} : vector<8x128xf32> to vector<8x32xf32>
    %302 = vector.extract_strided_slice %298 {offsets = [0, 96], sizes = [8, 32], strides = [1, 1]} : vector<8x128xf32> to vector<8x32xf32>
    %303 = arith.mulf %300, %265 : vector<8x32xf32>
    %304 = arith.mulf %299, %301 : vector<8x32xf32>
    %305 = arith.addf %303, %304 : vector<8x32xf32>
    %306 = math.tanh %305 : vector<8x32xf32>
    %307 = arith.mulf %302, %306 : vector<8x32xf32>
    %308 = vector.extract_strided_slice %23 {offsets = [56, 0], sizes = [8, 128], strides = [1, 1]} : vector<64x128xf32> to vector<8x128xf32>
    %cst_39 = arith.constant dense<0.000000e+00> : vector<8x128xf32>
    %309 = tpu.matmul %286, %13, %cst_39 {dimension_numbers = #tpu.dot_dimension_numbers<[1], [0], [0], [1], [0, 0, 1, 1], [], []>} : vector<8x32xf32>, vector<32x128xf32>, vector<8x128xf32> -> vector<8x128xf32>
    %310 = arith.addf %308, %309 : vector<8x128xf32>
    %311 = vector.broadcast %8 : vector<1x128xf32> to vector<8x128xf32>
    %312 = arith.mulf %310, %311 : vector<8x128xf32>
    %313 = math.tanh %312 : vector<8x128xf32>
    %314 = vector.broadcast %8 : vector<1x128xf32> to vector<8x128xf32>
    %315 = arith.mulf %313, %314 : vector<8x128xf32>
    %316 = vector.broadcast %11 : vector<1x128xf32> to vector<8x128xf32>
    %317 = arith.addf %315, %316 : vector<8x128xf32>
    %318 = vector.extract_strided_slice %317 {offsets = [0, 0], sizes = [8, 32], strides = [1, 1]} : vector<8x128xf32> to vector<8x32xf32>
    %319 = vector.extract_strided_slice %317 {offsets = [0, 32], sizes = [8, 32], strides = [1, 1]} : vector<8x128xf32> to vector<8x32xf32>
    %320 = vector.extract_strided_slice %317 {offsets = [0, 64], sizes = [8, 32], strides = [1, 1]} : vector<8x128xf32> to vector<8x32xf32>
    %321 = vector.extract_strided_slice %317 {offsets = [0, 96], sizes = [8, 32], strides = [1, 1]} : vector<8x128xf32> to vector<8x32xf32>
    %322 = arith.mulf %319, %284 : vector<8x32xf32>
    %323 = arith.mulf %318, %320 : vector<8x32xf32>
    %324 = arith.addf %322, %323 : vector<8x32xf32>
    %325 = math.tanh %324 : vector<8x32xf32>
    %326 = arith.mulf %321, %325 : vector<8x32xf32>
    %cst_40 = arith.constant dense<0.000000e+00> : vector<8x128xf32>
    %327 = tpu.matmul %326, %15, %cst_40 {dimension_numbers = #tpu.dot_dimension_numbers<[1], [0], [0], [1], [0, 0, 1, 1], [], []>} : vector<8x32xf32>, vector<32x128xf32>, vector<8x128xf32> -> vector<8x128xf32>
    %328 = vector.broadcast %17 : vector<1x128xf32> to vector<8x128xf32>
    %329 = arith.addf %327, %328 : vector<8x128xf32>
    %cst_41 = arith.constant dense<0.000000e+00> : vector<8x128xf32>
    %330 = tpu.matmul %307, %16, %cst_41 {dimension_numbers = #tpu.dot_dimension_numbers<[1], [0], [0], [1], [0, 0, 1, 1], [], []>} : vector<8x32xf32>, vector<32x128xf32>, vector<8x128xf32> -> vector<8x128xf32>
    %331 = arith.addf %329, %330 : vector<8x128xf32>
    %332 = vector.broadcast %8 : vector<1x128xf32> to vector<8x128xf32>
    %333 = arith.mulf %331, %332 : vector<8x128xf32>
    %334 = math.tanh %333 : vector<8x128xf32>
    %335 = vector.broadcast %8 : vector<1x128xf32> to vector<8x128xf32>
    %336 = arith.mulf %334, %335 : vector<8x128xf32>
    %337 = vector.broadcast %11 : vector<1x128xf32> to vector<8x128xf32>
    %338 = arith.addf %336, %337 : vector<8x128xf32>
    %339 = vector.extract_strided_slice %338 {offsets = [0, 0], sizes = [8, 32], strides = [1, 1]} : vector<8x128xf32> to vector<8x32xf32>
    %340 = vector.extract_strided_slice %338 {offsets = [0, 32], sizes = [8, 32], strides = [1, 1]} : vector<8x128xf32> to vector<8x32xf32>
    %341 = vector.extract_strided_slice %338 {offsets = [0, 64], sizes = [8, 32], strides = [1, 1]} : vector<8x128xf32> to vector<8x32xf32>
    %342 = vector.extract_strided_slice %338 {offsets = [0, 96], sizes = [8, 32], strides = [1, 1]} : vector<8x128xf32> to vector<8x32xf32>
    %343 = arith.mulf %340, %305 : vector<8x32xf32>
    %344 = arith.mulf %339, %341 : vector<8x32xf32>
    %345 = arith.addf %343, %344 : vector<8x32xf32>
    %346 = math.tanh %345 : vector<8x32xf32>
    %347 = arith.mulf %342, %346 : vector<8x32xf32>
    %cst_42 = arith.constant dense<0.000000e+00> : vector<8x128xf32>
    %348 = tpu.matmul %347, %18, %cst_42 {dimension_numbers = #tpu.dot_dimension_numbers<[1], [0], [0], [1], [0, 0, 1, 1], [], []>} : vector<8x32xf32>, vector<32x128xf32>, vector<8x128xf32> -> vector<8x128xf32>
    %349 = vector.broadcast %19 : vector<1x128xf32> to vector<8x128xf32>
    %350 = arith.addf %348, %349 : vector<8x128xf32>
    %c0_43 = arith.constant 0 : index
    %c0_44 = arith.constant 0 : index
    %351 = vector.load %arg2[%c0_43, %c0_44] : memref<8x128xf32, #tpu.memory_space<vmem>>, vector<8x128xf32>
    tpu.vector_store %arg2[%c0_43, %c0_44], %350 {strides = array<i32>} : memref<8x128xf32, #tpu.memory_space<vmem>>, vector<8x128xf32>,
    return
  }
}

</mosaic_0001>

<bundles_post_ra>
// kernel: forward.1
= control target key start
LH: loop header
LB: loop body
LE: loop exit
PB: predicated region body
PF: predicated region fallthrough
CT: control target
= control target key end

     0   :  { %7 = vsyncpa [#allocation3], 0  ;;  %s3122_s9 = smov [#allocation2]   ;;  %s3539_s0 = inlined_call_operand.vmem [shape: f32[64,8], index: 0, kind: input, shape index: {}]   ;;  %s3540_s1 = inlined_call_operand.hbm [shape: f32[160,128], index: 1, kind: input, shape index: {}]   ;;  %s3541_s2 = inlined_call_operand.vmem [shape: f32[8,128], index: 2, kind: output, shape index: {}]  }
   0x1   :  { %s15_s10 = sshll.u32 %s3122_s9, 4  ;;  %s3098_s13 = scalar_lea.hbm %s3540_s1, 2560  ;;  %s16_s10 = int_to_ptr.vmem [resolvable:$true] %s15_s10 }
   0x2   :  { %p3099_p0 = scmp.ne.s32.totalorder %s3540_s1, %s3098_s13  ;;  %p3102_p1 = scmp.lt.u32.totalorder %s3098_s13, %s3540_s1 }
   0x4   :  { %p3104_p2 = pnand %p3102_p1, %p3099_p0 }
   0x6   :  { %3107 = shalt.err (!%p3104_p2)
}
   0x7   :  { %s3108_s18 = scalar_lea.vmem %s16_s10, 2560  ;;  %p3113_p4 = scmp.lt.s32.totalorder %s16_s10, %s16_s10 }
   0x8   :  { %p3109_p3 = scmp.ne.s32.totalorder %s16_s10, %s3108_s18  ;;  %p3114_p5 = scmp.lt.s32.totalorder %s3108_s18, %s3108_s18 }
   0xa   :  { %p3115_p6 = por %p3114_p5, %p3113_p4 }
   0xc   :  { %p3116_p7 = pnand %p3115_p6, %p3109_p3 }
   0xe   :  { %3119 = shalt.err (!%p3116_p7)
}
   0xf   :  { %s3123_s19 = smov 128   ;;  %s3124_s20 = smov 8  }
  0x10   :  { %21 = dma.hbm_to_vmem [thread:$0]  %s3540_s1, 2560, %s16_s10, [#allocation3], %s3123_s19, %s3123_s19, %s3124_s20  }
  0x11   :  { %3120 = dma.done.wait [#allocation3], 2560  }
  0x12   :  { %3121 = vsyncadd [#allocation3], 4294964736  ;;  %v3125_v0 = vmov 0.0|0.0   ;;  %vm3126_vm0 = vmmov 0   ;;  %v3127_v1 = vmov 0.0   ;;  %vm64_vm1 = vcmask 64512  }
  0x13   :  { %2851 = vmatprep.subr.bf16.mxu1 %v3125_v0  ;;  %2584 = vmatprep.mubr.msk.f32.mxu1 %vm3126_vm0, %v3127_v1  ;;  %v33_v2 = vld [vmem:[#allocation2 + $0x8] sm:$0xff]  ;;  %v34_v3 = vld [vmem:[#allocation2 + $0x10] sm:$0xff]  ;;  %v32_v4 = vld [vmem:[#allocation2] sm:$0xff]  ;;  %v25_v11 = vlaneseq  ;;  %v3128_v17 = vmov 0.5   ;;  %s3129_s26 = smov 64   ;;  %s3130_s27 = smov 32  }
  0x14   :  { %v3161_v5 = vpack.c.bf16 %v34_v3, %v33_v2  ;;  %2562 = vmatprep.subr.mxu0 %v32_v4  ;;  %v52_v6 = vld [vmem:[%s3539_s0] sm:$0xff]  ;;  %v53_v7 = vld [vmem:[%s3539_s0 + $0x8] sm:$0xff]  ;;  %v35_v8 = vld [vmem:[#allocation2 + $0x18] sm:$0xff]  ;;  %vm194_vm5 = vcmask 261120  }
  0x15   :  { %2563 = vmatpush3.msra.mxu0 %v32_v4  ;;  %2564 = vmatprep.mubr.msk.f32.mxu0 %vm64_vm1, %v52_v6  ;;  %v36_v9 = vld [vmem:[#allocation2 + $0x20] sm:$0xff]  ;;  %v26_v12 = vand.u32 127, %v25_v11  ;;  %v3187_v14 = vld [vmem:[#allocation2 + $0x28] ss:$0 sm:$0xff]  ;;  %v54_v32 = vld [vmem:[%s3539_s0 + $0x10] sm:$0xff] }
  0x16   :  { %2853 = vmatpush3.bf16.msra.mxu1 %v3161_v5  ;;  %2565 = vmatmul.mubr.msk.f32.vlgmr.msra.gmra.mrb[0].mxu0 %vm64_vm1, %v53_v7  ;;  %v3172_v10 = vpack.c.bf16 %v36_v9, %v35_v8  ;;  %v55_v33 = vld [vmem:[%s3539_s0 + $0x18] sm:$0xff]  ;;  %v56_v34 = vld [vmem:[%s3539_s0 + $0x20] sm:$0xff]  ;;  %v38_v35 = vld [vmem:[#allocation2 + $0x30] sm:$0xff] }
  0x17   :  { %2854 = vmatprep.subr.bf16.mxu1 %v3125_v0  ;;  %2869 = vmatprep.subr.bf16.mxu0 %v3125_v0  ;;  %vm27_vm2 = vcmp.ge.s32.totalorder %v26_v12, 64  ;;  %vm28_vm3 = vcmp.lt.s32.totalorder %v26_v12, 96  ;;  %v39_v36 = vld [vmem:[#allocation2 + $0x38] sm:$0xff]  ;;  %v40_v38 = vld [vmem:[#allocation2 + $0x40] sm:$0xff]  ;;  %v57_v39 = vld [vmem:[%s3539_s0 + $0x28] sm:$0xff] }
  0x18   :  { %2871 = vmatpush3.bf16.msra.mxu0 %v3161_v5  ;;  %vm29_vm4 = vmand %vm27_vm2, %vm28_vm3  ;;  %2567 = vmatprep.mubr.msk.f32.mxu0 %vm64_vm1, %v54_v32  ;;  %v3213_v37 = vpack.c.bf16 %v39_v36, %v38_v35  ;;  %v41_v40 = vld [vmem:[#allocation2 + $0x48] sm:$0xff]  ;;  %v58_v41 = vld [vmem:[%s3539_s0 + $0x30] sm:$0xff] }
  0x19   :  { %2872 = vmatprep.subr.bf16.mxu0 %v3125_v0  ;;  %v3190_v18 = vsel %vm29_vm4, 1.0, %v3128_v17  ;;  %v3193_v24 = vsel %vm29_vm4, 0.0, %v3128_v17  ;;  %v3223_v42 = vpack.c.bf16 %v41_v40, %v40_v38  ;;  %v59_v43 = vld [vmem:[%s3539_s0 + $0x38] sm:$0xff]  ;;  %v42_v53 = vld [vmem:[#allocation2 + $0x50] sm:$0xff]  ;;  %v44_v56 = vld [vmem:[#allocation2 + $0x60] sm:$0xff] }
  0x1a   :  { %2856 = vmatpush3.bf16.msra.mxu1 %v3172_v10  ;;  %2568 = vmatmul.mubr.msk.f32.gmra.mrb[2].mxu0 %vm64_vm1, %v55_v33  ;;  %v43_v54 = vld [vmem:[#allocation2 + $0x58] sm:$0xff]  ;;  %v45_v57 = vld [vmem:[#allocation2 + $0x68] sm:$0xff]  ;;  %v3278_v3 = vld [vmem:[#allocation2 + $0x70] ss:$0 sm:$0xff] }
  0x1b   :  { %2857 = vmatprep.subr.bf16.mxu1 %v3125_v0  ;;  %2570 = vmatprep.mubr.msk.f32.mxu0 %vm64_vm1, %v56_v34  ;;  %v3250_v55 = vpack.c.bf16 %v43_v54, %v42_v53  ;;  %v3255_v59 = vpack.c.bf16 %v45_v57, %v44_v56 }
  0x1c   :  { %2874 = vmatpush3.bf16.msra.mxu0 %v3172_v10 }
  0x1d   :  { %2585 = vmatmul.mubr.f32.vlgmr.msra.gmra.mrb[0].mxu1 %v3127_v1  ;;  %2875 = vmatprep.subr.bf16.mxu0 %v3125_v0 }
  0x1e   :  { %2595 = vmatprep.mubr.msk.f32.mxu1 %vm3126_vm0, %v3127_v1  ;;  %2859 = vmatpush3.bf16.msra.mxu1 %v3213_v37 }
  0x1f   :  { %2860 = vmatprep.subr.bf16.mxu1 %v3125_v0  ;;  %2571 = vmatmul.mubr.msk.f32.gmra.mrb[4].mxu0 %vm64_vm1, %v57_v39 }
  0x20   :  { %2573 = vmatprep.mubr.msk.f32.mxu0 %vm64_vm1, %v58_v41 }
  0x22   :  { %2862 = vmatpush3.bf16.msra.mxu1 %v3223_v42 }
  0x23   :  { %2863 = vmatprep.subr.bf16.mxu1 %v3125_v0  ;;  %2574 = vmatmul.mubr.msk.f32.gmra.mrb[6].mxu0 %vm64_vm1, %v59_v43 }
  0x24   :  { %2617 = vmatprep.mubr.msk.f32.mxu0 %vm3126_vm0, %v3127_v1 }
  0xe9   :  { %v3185_v13 = vpop.f32.mrb[0].mxu0 }
  0xea   :  { %v155_v15 = vpop.f32.mrb[1].mxu0  ;;  %v161_v60 = vadd.f32 %v3185_v13, %v3187_v14 }
  0xeb   :  { %v156_v16 = vadd.f32 %v3187_v14, %v155_v15 }
  0xed   :  { %v3238_v47 = vpop.f32.mrb[2].mxu0 }
  0xee   :  { %v3240_v48 = vpop.f32.mrb[3].mxu0 }
  0xef   :  { %v166_v38 = vadd.f32 %v3187_v14, %v3240_v48 }
  0xf0   :  { %v264_v19 = vpop.f32.mrb[0].mxu1 }
  0xf1   :  { %v268_v20 = vadd.f32 %v264_v19, %v156_v16  ;;  %v2586_v21 = vpop.f32.mrb[1].mxu1 }
  0xf2   :  { %v3242_v49 = vpop.f32.mrb[4].mxu0 }
  0xf3   :  { %v269_v22 = vmul.f32 %v268_v20, %v3190_v18  ;;  %v3244_v50 = vpop.f32.mrb[5].mxu0 }
  0xf5   :  { %3034 = vtanh.f32 %v269_v22 }
  0xf6   :  { %v3246_v51 = vpop.f32.mrb[6].mxu0 }
  0xf7   :  { %v3248_v52 = vpop.f32.mrb[7].mxu0 }
  0xff   :  { %v3035_v23 = vpop.eup %3034 }
 0x100   :  { %v271_v25 = vmul.f32 %v3035_v23, %v3190_v18 }
 0x102   :  { %v272_v26 = vadd.f32 %v271_v25, %v3193_v24 }
 0x104   :  { %275 = vrot.lane.b32.xlu0 %v272_v26, %s3129_s26  ;;  %v273_v29 = vmul.f32 0.0, %v272_v26 }
 0x176   :  { %v276_v27 = vpop.permute.xlu0 %275 }
 0x177   :  { %v278_v28 = vmul.f32 %v276_v27, %v272_v26 }
 0x179   :  { %280 = vrot.lane.b32.xlu0 %v278_v28, %s3130_s27 }
 0x1eb   :  { %v281_v30 = vpop.permute.xlu0 %280 }
 0x1ec   :  { %v3199_v31 = vadd.f32 %v281_v30, %v273_v29 }
 0x1ee   :  { %3036 = vtanh.f32 %v3199_v31 }
 0x1f8   :  { %v3037_v44 = vpop.eup %3036 }
 0x1f9   :  { %286 = vrot.lane.b32.xlu1 %v3037_v44, %s3129_s26 }
 0x26b   :  { %v287_v45 = vpop.permute.xlu1 %286 }
 0x26c   :  { %v289_v46 = vmul.f32 %v287_v45, %v272_v26 }
 0x26e   :  { %295 = vrot.lane.b32.xlu1 %v289_v46, %s3130_s27 }
 0x2e0   :  { %v296_v58 = vpop.permute.xlu1 %295 }
 0x2e1   :  { %2596 = vmatmul.mubr.msk.f32.vlgmr.msra.gmra.mrb[2].mxu1 %vm194_vm5, %v296_v58  ;;  %2618 = vmatmul.mubr.msk.f32.vlgmr.msra.gmra.mrb[8].mxu0 %vm194_vm5, %v296_v58 }
 0x2e2   :  { %2865 = vmatpush3.bf16.msra.mxu1 %v3250_v55  ;;  %2606 = vmatprep.mubr.msk.f32.mxu1 %vm3126_vm0, %v3127_v1 }
 0x2e3   :  { %2866 = vmatprep.subr.bf16.mxu1 %v3125_v0  ;;  %2877 = vmatpush3.bf16.msra.mxu0 %v3213_v37 }
 0x2e4   :  { %2878 = vmatprep.subr.bf16.mxu0 %v3125_v0  ;;  %2628 = vmatprep.mubr.msk.f32.mxu0 %vm3126_vm0, %v3127_v1 }
 0x2e6   :  { %2868 = vmatpush3.bf16.msra.mxu1 %v3255_v59 }
 0x2e7   :  { %2887 = vmatprep.subr.bf16.mxu1 %v3125_v0  ;;  %2880 = vmatpush3.bf16.msra.mxu0 %v3223_v42 }
 0x2e8   :  { %2881 = vmatprep.subr.bf16.mxu0 %v3125_v0 }
 0x2e9   :  { %2607 = vmatmul.mubr.f32.vlgmr.msra.gmra.mrb[2].mxu1 %v3127_v1 }
 0x2ea   :  { %2889 = vmatpush3.bf16.msra.mxu1 %v3161_v5  ;;  %2650 = vmatprep.mubr.msk.f32.mxu1 %vm3126_vm0, %v3127_v1 }
 0x2eb   :  { %2890 = vmatprep.subr.bf16.mxu1 %v3125_v0 }
 0x2ee   :  { %2892 = vmatpush3.bf16.msra.mxu1 %v3172_v10 }
 0x2ef   :  { %2893 = vmatprep.subr.bf16.mxu1 %v3125_v0 }
 0x3b4   :  { %v527_v61 = vpop.f32.mrb[8].mxu0 }
 0x3b5   :  { %v531_v62 = vadd.f32 %v527_v61, %v161_v60  ;;  %v2619_v63 = vpop.f32.mrb[9].mxu0 }
 0x3b7   :  { %v532_v2 = vmul.f32 %v531_v62, %v3190_v18 }
 0x3b9   :  { %3038 = vtanh.f32 %v532_v2 }
 0x3bc   :  { %v435_v4 = vpop.f32.mrb[2].mxu1 }
 0x3bd   :  { %v3001_v6 = vadd.f32 %v3278_v3, %v435_v4  ;;  %v2608_v7 = vpop.f32.mrb[3].mxu1 }
 0x3bf   :  { %v440_v8 = vmul.f32 %v3001_v6, %v3190_v18 }
 0x3c1   :  { %3040 = vtanh.f32 %v440_v8 }
 0x3c3   :  { %v3039_v9 = vpop.eup %3038 }
 0x3c4   :  { %v534_v11 = vmul.f32 %v3039_v9, %v3190_v18 }
 0x3c6   :  { %v535_v12 = vadd.f32 %v534_v11, %v3193_v24 }
 0x3c8   :  { %538 = vrot.lane.b32.xlu0 %v535_v12, %s3129_s26  ;;  %v536_v22 = vmul.f32 %v535_v12, %v3199_v31 }
 0x3cb   :  { %v3041_v13 = vpop.eup %3040 }
 0x3cc   :  { %v442_v15 = vmul.f32 %v3041_v13, %v3190_v18 }
 0x3ce   :  { %v443_v16 = vadd.f32 %v442_v15, %v3193_v24 }
 0x3d0   :  { %446 = vrot.lane.b32.xlu1 %v443_v16, %s3129_s26  ;;  %v444_v26 = vmul.f32 0.0, %v443_v16 }
 0x43a   :  { %v539_v17 = vpop.permute.xlu0 %538 }
 0x43b   :  { %v541_v19 = vmul.f32 %v539_v17, %v535_v12 }
 0x43d   :  { %543 = vrot.lane.b32.xlu0 %v541_v19, %s3130_s27 }
 0x442   :  { %v447_v20 = vpop.permute.xlu1 %446 }
 0x443   :  { %v449_v21 = vmul.f32 %v447_v20, %v443_v16 }
 0x445   :  { %451 = vrot.lane.b32.xlu1 %v449_v21, %s3130_s27 }
 0x4af   :  { %v544_v23 = vpop.permute.xlu0 %543 }
 0x4b0   :  { %v546_v25 = vadd.f32 %v544_v23, %v536_v22  ;;  %v171_v22 = vadd.f32 %v3238_v47, %v3187_v14 }
 0x4b2   :  { %3042 = vtanh.f32 %v546_v25 }
 0x4b7   :  { %v452_v27 = vpop.permute.xlu1 %451 }
 0x4b8   :  { %v454_v28 = vadd.f32 %v452_v27, %v444_v26 }
 0x4ba   :  { %3044 = vtanh.f32 %v454_v28 }
 0x4bc   :  { %v3043_v29 = vpop.eup %3042 }
 0x4bd   :  { %549 = vrot.lane.b32.xlu0 %v3043_v29, %s3129_s26 }
 0x4c4   :  { %v3045_v30 = vpop.eup %3044 }
 0x4c5   :  { %457 = vrot.lane.b32.xlu1 %v3045_v30, %s3129_s26 }
 0x52f   :  { %v550_v32 = vpop.permute.xlu0 %549 }
 0x530   :  { %v552_v33 = vmul.f32 %v550_v32, %v535_v12 }
 0x532   :  { %554 = vrot.lane.b32.xlu0 %v552_v33, %s3130_s27 }
 0x537   :  { %v458_v34 = vpop.permute.xlu1 %457 }
 0x538   :  { %v460_v35 = vmul.f32 %v458_v34, %v443_v16 }
 0x53a   :  { %629 = vrot.lane.b32.xlu1 %v460_v35, %s3130_s27 }
 0x5a4   :  { %v555_v31 = vpop.permute.xlu0 %554 }
 0x5a5   :  { %2629 = vmatmul.mubr.msk.f32.vlgmr.msra.gmra.mrb[10].mxu0 %vm194_vm5, %v555_v31  ;;  %2651 = vmatmul.mubr.msk.f32.vlgmr.msra.gmra.mrb[4].mxu1 %vm194_vm5, %v555_v31 }
 0x5a6   :  { %2883 = vmatpush3.bf16.msra.mxu0 %v3250_v55  ;;  %2639 = vmatprep.mubr.msk.f32.mxu0 %vm3126_vm0, %v3127_v1 }
 0x5a7   :  { %2884 = vmatprep.subr.bf16.mxu0 %v3125_v0  ;;  %2895 = vmatpush3.bf16.msra.mxu1 %v3213_v37 }
 0x5a8   :  { %2896 = vmatprep.subr.bf16.mxu1 %v3125_v0  ;;  %2661 = vmatprep.mubr.msk.f32.mxu1 %vm3126_vm0, %v3127_v1 }
 0x5aa   :  { %2886 = vmatpush3.bf16.msra.mxu0 %v3255_v59 }
 0x5ab   :  { %2905 = vmatprep.subr.bf16.mxu0 %v3125_v0  ;;  %2898 = vmatpush3.bf16.msra.mxu1 %v3223_v42 }
 0x5ac   :  { %v630_v36 = vpop.permute.xlu1 %629  ;;  %2899 = vmatprep.subr.bf16.mxu1 %v3125_v0 }
 0x5ad   :  { %2640 = vmatmul.mubr.msk.f32.vlgmr.msra.gmra.mrb[10].mxu0 %vm194_vm5, %v630_v36 }
 0x5ae   :  { %2907 = vmatpush3.bf16.msra.mxu0 %v3161_v5  ;;  %2683 = vmatprep.mubr.msk.f32.mxu0 %vm3126_vm0, %v3127_v1 }
 0x5af   :  { %2908 = vmatprep.subr.bf16.mxu0 %v3125_v0 }
 0x5b2   :  { %2910 = vmatpush3.bf16.msra.mxu0 %v3172_v10 }
 0x5b3   :  { %2911 = vmatprep.subr.bf16.mxu0 %v3125_v0 }
 0x678   :  { %v791_v39 = vpop.f32.mrb[4].mxu1 }
 0x679   :  { %v795_v40 = vadd.f32 %v791_v39, %v166_v38  ;;  %v2652_v41 = vpop.f32.mrb[5].mxu1 }
 0x67b   :  { %v796_v43 = vmul.f32 %v795_v40, %v3190_v18 }
 0x67d   :  { %3046 = vtanh.f32 %v796_v43 }
 0x680   :  { %v699_v44 = vpop.f32.mrb[10].mxu0 }
 0x681   :  { %v3002_v45 = vadd.f32 %v3278_v3, %v699_v44  ;;  %v2641_v46 = vpop.f32.mrb[11].mxu0 }
 0x683   :  { %v704_v53 = vmul.f32 %v3002_v45, %v3190_v18 }
 0x685   :  { %3048 = vtanh.f32 %v704_v53 }
 0x687   :  { %v3047_v54 = vpop.eup %3046 }
 0x688   :  { %v798_v56 = vmul.f32 %v3047_v54, %v3190_v18 }
 0x68a   :  { %v799_v57 = vadd.f32 %v798_v56, %v3193_v24 }
 0x68c   :  { %802 = vrot.lane.b32.xlu0 %v799_v57, %s3129_s26  ;;  %v800_v4 = vmul.f32 %v799_v57, %v546_v25 }
 0x68f   :  { %v3049_v48 = vpop.eup %3048 }
 0x690   :  { %v706_v58 = vmul.f32 %v3049_v48, %v3190_v18 }
 0x692   :  { %v707_v60 = vadd.f32 %v706_v58, %v3193_v24 }
 0x694   :  { %710 = vrot.lane.b32.xlu1 %v707_v60, %s3129_s26  ;;  %v708_v8 = vmul.f32 %v707_v60, %v454_v28 }
 0x6fe   :  { %v803_v61 = vpop.permute.xlu0 %802 }
 0x6ff   :  { %v805_v62 = vmul.f32 %v803_v61, %v799_v57 }
 0x701   :  { %807 = vrot.lane.b32.xlu0 %v805_v62, %s3130_s27 }
 0x706   :  { %v711_v63 = vpop.permute.xlu1 %710 }
 0x707   :  { %v713_v2 = vmul.f32 %v711_v63, %v707_v60 }
 0x709   :  { %715 = vrot.lane.b32.xlu1 %v713_v2, %s3130_s27  ;;  %v176_v2 = vadd.f32 %v3187_v14, %v3244_v50 }
 0x773   :  { %v808_v6 = vpop.permute.xlu0 %807 }
 0x774   :  { %v810_v7 = vadd.f32 %v808_v6, %v800_v4 }
 0x776   :  { %3050 = vtanh.f32 %v810_v7 }
 0x77b   :  { %v716_v9 = vpop.permute.xlu1 %715 }
 0x77c   :  { %v718_v11 = vadd.f32 %v716_v9, %v708_v8 }
 0x77e   :  { %3052 = vtanh.f32 %v718_v11 }
 0x780   :  { %v3051_v12 = vpop.eup %3050 }
 0x781   :  { %813 = vrot.lane.b32.xlu0 %v3051_v12, %s3129_s26 }
 0x788   :  { %v3053_v13 = vpop.eup %3052 }
 0x789   :  { %721 = vrot.lane.b32.xlu1 %v3053_v13, %s3129_s26 }
 0x7f3   :  { %v814_v15 = vpop.permute.xlu0 %813 }
 0x7f4   :  { %v816_v16 = vmul.f32 %v814_v15, %v799_v57 }
 0x7f6   :  { %818 = vrot.lane.b32.xlu0 %v816_v16, %s3130_s27 }
 0x7fb   :  { %v722_v17 = vpop.permute.xlu1 %721 }
 0x7fc   :  { %v724_v19 = vmul.f32 %v722_v17, %v707_v60 }
 0x7fe   :  { %893 = vrot.lane.b32.xlu1 %v724_v19, %s3130_s27 }
 0x868   :  { %v819_v20 = vpop.permute.xlu0 %818 }
 0x869   :  { %2662 = vmatmul.mubr.msk.f32.vlgmr.msra.gmra.mrb[6].mxu1 %vm194_vm5, %v819_v20  ;;  %2684 = vmatmul.mubr.msk.f32.vlgmr.msra.gmra.mrb[12].mxu0 %vm194_vm5, %v819_v20 }
 0x86a   :  { %2901 = vmatpush3.bf16.msra.mxu1 %v3250_v55  ;;  %2672 = vmatprep.mubr.msk.f32.mxu1 %vm3126_vm0, %v3127_v1 }
 0x86b   :  { %2902 = vmatprep.subr.bf16.mxu1 %v3125_v0  ;;  %2913 = vmatpush3.bf16.msra.mxu0 %v3213_v37 }
 0x86c   :  { %2914 = vmatprep.subr.bf16.mxu0 %v3125_v0  ;;  %2694 = vmatprep.mubr.msk.f32.mxu0 %vm3126_vm0, %v3127_v1 }
 0x86e   :  { %2904 = vmatpush3.bf16.msra.mxu1 %v3255_v59 }
 0x86f   :  { %2923 = vmatprep.subr.bf16.mxu1 %v3125_v0  ;;  %2916 = vmatpush3.bf16.msra.mxu0 %v3223_v42 }
 0x870   :  { %v894_v21 = vpop.permute.xlu1 %893  ;;  %2917 = vmatprep.subr.bf16.mxu0 %v3125_v0 }
 0x871   :  { %2673 = vmatmul.mubr.msk.f32.vlgmr.msra.gmra.mrb[6].mxu1 %vm194_vm5, %v894_v21 }
 0x872   :  { %2925 = vmatpush3.bf16.msra.mxu1 %v3161_v5  ;;  %2716 = vmatprep.mubr.msk.f32.mxu1 %vm3126_vm0, %v3127_v1 }
 0x873   :  { %2926 = vmatprep.subr.bf16.mxu1 %v3125_v0 }
 0x876   :  { %2928 = vmatpush3.bf16.msra.mxu1 %v3172_v10 }
 0x877   :  { %2929 = vmatprep.subr.bf16.mxu1 %v3125_v0 }
 0x93c   :  { %v1055_v23 = vpop.f32.mrb[12].mxu0 }
 0x93d   :  { %v1059_v25 = vadd.f32 %v1055_v23, %v171_v22  ;;  %v2685_v26 = vpop.f32.mrb[13].mxu0 }
 0x93f   :  { %v1060_v27 = vmul.f32 %v1059_v25, %v3190_v18 }
 0x941   :  { %3054 = vtanh.f32 %v1060_v27 }
 0x944   :  { %v963_v28 = vpop.f32.mrb[6].mxu1 }
 0x945   :  { %v3003_v29 = vadd.f32 %v3278_v3, %v963_v28  ;;  %v2674_v30 = vpop.f32.mrb[7].mxu1 }
 0x947   :  { %v968_v32 = vmul.f32 %v3003_v29, %v3190_v18 }
 0x949   :  { %3056 = vtanh.f32 %v968_v32 }
 0x94b   :  { %v3055_v33 = vpop.eup %3054 }
 0x94c   :  { %v1062_v34 = vmul.f32 %v3055_v33, %v3190_v18 }
 0x94e   :  { %v1063_v35 = vadd.f32 %v1062_v34, %v3193_v24 }
 0x950   :  { %1066 = vrot.lane.b32.xlu0 %v1063_v35, %s3129_s26  ;;  %v1064_v43 = vmul.f32 %v1063_v35, %v810_v7 }
 0x953   :  { %v3057_v47 = vpop.eup %3056 }
 0x954   :  { %v970_v31 = vmul.f32 %v3057_v47, %v3190_v18 }
 0x956   :  { %v971_v36 = vadd.f32 %v970_v31, %v3193_v24 }
 0x958   :  { %974 = vrot.lane.b32.xlu1 %v971_v36, %s3129_s26  ;;  %v972_v46 = vmul.f32 %v971_v36, %v718_v11 }
 0x9c2   :  { %v1067_v38 = vpop.permute.xlu0 %1066 }
 0x9c3   :  { %v1069_v39 = vmul.f32 %v1067_v38, %v1063_v35 }
 0x9c5   :  { %1071 = vrot.lane.b32.xlu0 %v1069_v39, %s3130_s27 }
 0x9ca   :  { %v975_v40 = vpop.permute.xlu1 %974 }
 0x9cb   :  { %v977_v41 = vmul.f32 %v975_v40, %v971_v36  ;;  %v181_v40 = vadd.f32 %v3242_v49, %v3187_v14 }
 0x9cd   :  { %979 = vrot.lane.b32.xlu1 %v977_v41, %s3130_s27 }
 0xa37   :  { %v1072_v44 = vpop.permute.xlu0 %1071 }
 0xa38   :  { %v1074_v45 = vadd.f32 %v1072_v44, %v1064_v43 }
 0xa3a   :  { %3058 = vtanh.f32 %v1074_v45 }
 0xa3f   :  { %v980_v53 = vpop.permute.xlu1 %979 }
 0xa40   :  { %v982_v54 = vadd.f32 %v980_v53, %v972_v46 }
 0xa42   :  { %3060 = vtanh.f32 %v982_v54 }
 0xa44   :  { %v3059_v56 = vpop.eup %3058 }
 0xa45   :  { %1077 = vrot.lane.b32.xlu0 %v3059_v56, %s3129_s26 }
 0xa4c   :  { %v3061_v57 = vpop.eup %3060 }
 0xa4d   :  { %985 = vrot.lane.b32.xlu1 %v3061_v57, %s3129_s26 }
 0xab7   :  { %v1078_v48 = vpop.permute.xlu0 %1077 }
 0xab8   :  { %v1080_v58 = vmul.f32 %v1078_v48, %v1063_v35 }
 0xaba   :  { %1082 = vrot.lane.b32.xlu0 %v1080_v58, %s3130_s27 }
 0xabf   :  { %v986_v60 = vpop.permute.xlu1 %985 }
 0xac0   :  { %v988_v61 = vmul.f32 %v986_v60, %v971_v36 }
 0xac2   :  { %1157 = vrot.lane.b32.xlu1 %v988_v61, %s3130_s27 }
 0xb2c   :  { %v1083_v62 = vpop.permute.xlu0 %1082 }
 0xb2d   :  { %2695 = vmatmul.mubr.msk.f32.vlgmr.msra.gmra.mrb[14].mxu0 %vm194_vm5, %v1083_v62  ;;  %2717 = vmatmul.mubr.msk.f32.vlgmr.msra.gmra.mrb[8].mxu1 %vm194_vm5, %v1083_v62 }
 0xb2e   :  { %2919 = vmatpush3.bf16.msra.mxu0 %v3250_v55  ;;  %2705 = vmatprep.mubr.msk.f32.mxu0 %vm3126_vm0, %v3127_v1 }
 0xb2f   :  { %2920 = vmatprep.subr.bf16.mxu0 %v3125_v0  ;;  %2931 = vmatpush3.bf16.msra.mxu1 %v3213_v37 }
 0xb30   :  { %2932 = vmatprep.subr.bf16.mxu1 %v3125_v0  ;;  %2727 = vmatprep.mubr.msk.f32.mxu1 %vm3126_vm0, %v3127_v1 }
 0xb32   :  { %2922 = vmatpush3.bf16.msra.mxu0 %v3255_v59 }
 0xb33   :  { %2941 = vmatprep.subr.bf16.mxu0 %v3125_v0  ;;  %2934 = vmatpush3.bf16.msra.mxu1 %v3223_v42 }
 0xb34   :  { %v1158_v63 = vpop.permute.xlu1 %1157  ;;  %2935 = vmatprep.subr.bf16.mxu1 %v3125_v0 }
 0xb35   :  { %2706 = vmatmul.mubr.msk.f32.vlgmr.msra.gmra.mrb[14].mxu0 %vm194_vm5, %v1158_v63 }
 0xb36   :  { %2943 = vmatpush3.bf16.msra.mxu0 %v3161_v5  ;;  %2749 = vmatprep.mubr.msk.f32.mxu0 %vm3126_vm0, %v3127_v1 }
 0xb37   :  { %2944 = vmatprep.subr.bf16.mxu0 %v3125_v0 }
 0xb3a   :  { %2946 = vmatpush3.bf16.msra.mxu0 %v3172_v10 }
 0xb3b   :  { %2947 = vmatprep.subr.bf16.mxu0 %v3125_v0 }
 0xc00   :  { %v1319_v4 = vpop.f32.mrb[8].mxu1 }
 0xc01   :  { %v1323_v6 = vadd.f32 %v1319_v4, %v176_v2  ;;  %v2718_v7 = vpop.f32.mrb[9].mxu1 }
 0xc03   :  { %v1324_v8 = vmul.f32 %v1323_v6, %v3190_v18 }
 0xc05   :  { %3062 = vtanh.f32 %v1324_v8 }
 0xc08   :  { %v1227_v9 = vpop.f32.mrb[14].mxu0 }
 0xc09   :  { %v3004_v11 = vadd.f32 %v3278_v3, %v1227_v9  ;;  %v2707_v12 = vpop.f32.mrb[15].mxu0 }
 0xc0b   :  { %v1232_v13 = vmul.f32 %v3004_v11, %v3190_v18 }
 0xc0d   :  { %3064 = vtanh.f32 %v1232_v13 }
 0xc0f   :  { %v3063_v15 = vpop.eup %3062 }
 0xc10   :  { %v1326_v16 = vmul.f32 %v3063_v15, %v3190_v18 }
 0xc12   :  { %v1327_v17 = vadd.f32 %v1326_v16, %v3193_v24 }
 0xc14   :  { %1330 = vrot.lane.b32.xlu0 %v1327_v17, %s3129_s26  ;;  %v1328_v26 = vmul.f32 %v1327_v17, %v1074_v45 }
 0xc17   :  { %v3065_v50 = vpop.eup %3064 }
 0xc18   :  { %v1234_v19 = vmul.f32 %v3065_v50, %v3190_v18 }
 0xc1a   :  { %v1235_v20 = vadd.f32 %v1234_v19, %v3193_v24 }
 0xc1c   :  { %1238 = vrot.lane.b32.xlu1 %v1235_v20, %s3129_s26  ;;  %v1236_v29 = vmul.f32 %v1235_v20, %v982_v54 }
 0xc86   :  { %v1331_v21 = vpop.permute.xlu0 %1330 }
 0xc87   :  { %v1333_v22 = vmul.f32 %v1331_v21, %v1327_v17 }
 0xc89   :  { %1335 = vrot.lane.b32.xlu0 %v1333_v22, %s3130_s27  ;;  %v186_v22 = vadd.f32 %v3187_v14, %v3248_v52 }
 0xc8e   :  { %v1239_v23 = vpop.permute.xlu1 %1238 }
 0xc8f   :  { %v1241_v25 = vmul.f32 %v1239_v23, %v1235_v20 }
 0xc91   :  { %1243 = vrot.lane.b32.xlu1 %v1241_v25, %s3130_s27 }
 0xcfb   :  { %v1336_v27 = vpop.permute.xlu0 %1335 }
 0xcfc   :  { %v1338_v28 = vadd.f32 %v1336_v27, %v1328_v26 }
 0xcfe   :  { %3066 = vtanh.f32 %v1338_v28 }
 0xd03   :  { %v1244_v30 = vpop.permute.xlu1 %1243 }
 0xd04   :  { %v1246_v32 = vadd.f32 %v1244_v30, %v1236_v29 }
 0xd06   :  { %3068 = vtanh.f32 %v1246_v32 }
 0xd08   :  { %v3067_v33 = vpop.eup %3066 }
 0xd09   :  { %1341 = vrot.lane.b32.xlu0 %v3067_v33, %s3129_s26 }
 0xd10   :  { %v3069_v34 = vpop.eup %3068 }
 0xd11   :  { %1249 = vrot.lane.b32.xlu1 %v3069_v34, %s3129_s26 }
 0xd7b   :  { %v1342_v35 = vpop.permute.xlu0 %1341 }
 0xd7c   :  { %v1344_v47 = vmul.f32 %v1342_v35, %v1327_v17 }
 0xd7e   :  { %1346 = vrot.lane.b32.xlu0 %v1344_v47, %s3130_s27 }
 0xd83   :  { %v1250_v31 = vpop.permute.xlu1 %1249 }
 0xd84   :  { %v1252_v36 = vmul.f32 %v1250_v31, %v1235_v20 }
 0xd86   :  { %1421 = vrot.lane.b32.xlu1 %v1252_v36, %s3130_s27 }
 0xdf0   :  { %v1347_v38 = vpop.permute.xlu0 %1346 }
 0xdf1   :  { %2728 = vmatmul.mubr.msk.f32.vlgmr.msra.gmra.mrb[10].mxu1 %vm194_vm5, %v1347_v38  ;;  %2750 = vmatmul.mubr.msk.f32.vlgmr.msra.gmra.mrb[16].mxu0 %vm194_vm5, %v1347_v38 }
 0xdf2   :  { %2937 = vmatpush3.bf16.msra.mxu1 %v3250_v55  ;;  %2738 = vmatprep.mubr.msk.f32.mxu1 %vm3126_vm0, %v3127_v1 }
 0xdf3   :  { %2938 = vmatprep.subr.bf16.mxu1 %v3125_v0  ;;  %2949 = vmatpush3.bf16.msra.mxu0 %v3213_v37 }
 0xdf4   :  { %2950 = vmatprep.subr.bf16.mxu0 %v3125_v0  ;;  %2760 = vmatprep.mubr.msk.f32.mxu0 %vm3126_vm0, %v3127_v1 }
 0xdf6   :  { %2940 = vmatpush3.bf16.msra.mxu1 %v3255_v59 }
 0xdf7   :  { %2959 = vmatprep.subr.bf16.mxu1 %v3125_v0  ;;  %2952 = vmatpush3.bf16.msra.mxu0 %v3223_v42 }
 0xdf8   :  { %v1422_v39 = vpop.permute.xlu1 %1421  ;;  %2953 = vmatprep.subr.bf16.mxu0 %v3125_v0 }
 0xdf9   :  { %2739 = vmatmul.mubr.msk.f32.vlgmr.msra.gmra.mrb[10].mxu1 %vm194_vm5, %v1422_v39 }
 0xdfa   :  { %2961 = vmatpush3.bf16.msra.mxu1 %v3161_v5  ;;  %2782 = vmatprep.mubr.msk.f32.mxu1 %vm3126_vm0, %v3127_v1 }
 0xdfb   :  { %2962 = vmatprep.subr.bf16.mxu1 %v3125_v0 }
 0xdfe   :  { %2964 = vmatpush3.bf16.msra.mxu1 %v3172_v10 }
 0xdff   :  { %2965 = vmatprep.subr.bf16.mxu1 %v3125_v0 }
 0xec4   :  { %v1583_v41 = vpop.f32.mrb[16].mxu0 }
 0xec5   :  { %v1587_v43 = vadd.f32 %v1583_v41, %v181_v40  ;;  %v2751_v44 = vpop.f32.mrb[17].mxu0 }
 0xec7   :  { %v1588_v45 = vmul.f32 %v1587_v43, %v3190_v18 }
 0xec9   :  { %3070 = vtanh.f32 %v1588_v45 }
 0xecc   :  { %v1491_v46 = vpop.f32.mrb[10].mxu1 }
 0xecd   :  { %v3005_v53 = vadd.f32 %v3278_v3, %v1491_v46  ;;  %v2740_v54 = vpop.f32.mrb[11].mxu1 }
 0xecf   :  { %v1496_v56 = vmul.f32 %v3005_v53, %v3190_v18 }
 0xed1   :  { %3072 = vtanh.f32 %v1496_v56 }
 0xed3   :  { %v3071_v57 = vpop.eup %3070 }
 0xed4   :  { %v1590_v48 = vmul.f32 %v3071_v57, %v3190_v18 }
 0xed6   :  { %v1591_v58 = vadd.f32 %v1590_v48, %v3193_v24 }
 0xed8   :  { %1594 = vrot.lane.b32.xlu0 %v1591_v58, %s3129_s26  ;;  %v1592_v6 = vmul.f32 %v1591_v58, %v1338_v28 }
 0xedb   :  { %v3073_v49 = vpop.eup %3072 }
 0xedc   :  { %v1498_v60 = vmul.f32 %v3073_v49, %v3190_v18 }
 0xede   :  { %v1499_v61 = vadd.f32 %v1498_v60, %v3193_v24 }
 0xee0   :  { %1502 = vrot.lane.b32.xlu1 %v1499_v61, %s3129_s26  ;;  %v1500_v9 = vmul.f32 %v1499_v61, %v1246_v32 }
 0xf4a   :  { %v1595_v62 = vpop.permute.xlu0 %1594 }
 0xf4b   :  { %v1597_v63 = vmul.f32 %v1595_v62, %v1591_v58 }
 0xf4d   :  { %1599 = vrot.lane.b32.xlu0 %v1597_v63, %s3130_s27 }
 0xf52   :  { %v1503_v2 = vpop.permute.xlu1 %1502 }
 0xf53   :  { %v1505_v4 = vmul.f32 %v1503_v2, %v1499_v61 }
 0xf55   :  { %1507 = vrot.lane.b32.xlu1 %v1505_v4, %s3130_s27 }
 0xfbf   :  { %v1600_v7 = vpop.permute.xlu0 %1599 }
 0xfc0   :  { %v1602_v8 = vadd.f32 %v1600_v7, %v1592_v6 }
 0xfc2   :  { %3074 = vtanh.f32 %v1602_v8 }
 0xfc7   :  { %v1508_v11 = vpop.permute.xlu1 %1507 }
 0xfc8   :  { %v1510_v12 = vadd.f32 %v1508_v11, %v1500_v9 }
 0xfca   :  { %3076 = vtanh.f32 %v1510_v12 }
 0xfcc   :  { %v3075_v13 = vpop.eup %3074 }
 0xfcd   :  { %1605 = vrot.lane.b32.xlu0 %v3075_v13, %s3129_s26 }
 0xfd4   :  { %v3077_v15 = vpop.eup %3076 }
 0xfd5   :  { %1513 = vrot.lane.b32.xlu1 %v3077_v15, %s3129_s26 }
0x103f   :  { %v1606_v16 = vpop.permute.xlu0 %1605 }
0x1040   :  { %v1608_v17 = vmul.f32 %v1606_v16, %v1591_v58 }
0x1042   :  { %1610 = vrot.lane.b32.xlu0 %v1608_v17, %s3130_s27 }
0x1047   :  { %v1514_v50 = vpop.permute.xlu1 %1513 }
0x1048   :  { %v1516_v19 = vmul.f32 %v1514_v50, %v1499_v61 }
0x104a   :  { %1685 = vrot.lane.b32.xlu1 %v1516_v19, %s3130_s27 }
0x10b4   :  { %v1611_v20 = vpop.permute.xlu0 %1610 }
0x10b5   :  { %2761 = vmatmul.mubr.msk.f32.vlgmr.msra.gmra.mrb[18].mxu0 %vm194_vm5, %v1611_v20  ;;  %2783 = vmatmul.mubr.msk.f32.vlgmr.msra.gmra.mrb[12].mxu1 %vm194_vm5, %v1611_v20 }
0x10b6   :  { %2955 = vmatpush3.bf16.msra.mxu0 %v3250_v55  ;;  %2771 = vmatprep.mubr.msk.f32.mxu0 %vm3126_vm0, %v3127_v1 }
0x10b7   :  { %2956 = vmatprep.subr.bf16.mxu0 %v3125_v0  ;;  %2967 = vmatpush3.bf16.msra.mxu1 %v3213_v37 }
0x10b8   :  { %2968 = vmatprep.subr.bf16.mxu1 %v3125_v0  ;;  %2793 = vmatprep.mubr.msk.f32.mxu1 %vm3126_vm0, %v3127_v1 }
0x10ba   :  { %2958 = vmatpush3.bf16.msra.mxu0 %v3255_v59 }
0x10bb   :  { %2977 = vmatprep.subr.bf16.mxu0 %v3125_v0  ;;  %2970 = vmatpush3.bf16.msra.mxu1 %v3223_v42 }
0x10bc   :  { %v1686_v21 = vpop.permute.xlu1 %1685  ;;  %2971 = vmatprep.subr.bf16.mxu1 %v3125_v0 }
0x10bd   :  { %2772 = vmatmul.mubr.msk.f32.vlgmr.msra.gmra.mrb[18].mxu0 %vm194_vm5, %v1686_v21 }
0x10be   :  { %2979 = vmatpush3.bf16.msra.mxu0 %v3161_v5  ;;  %2815 = vmatprep.mubr.msk.f32.mxu0 %vm3126_vm0, %v3127_v1 }
0x10bf   :  { %2980 = vmatprep.subr.bf16.mxu0 %v3125_v0 }
0x10c2   :  { %2982 = vmatpush3.bf16.msra.mxu0 %v3172_v10 }
0x10c3   :  { %2983 = vmatprep.subr.bf16.mxu0 %v3125_v0 }
0x1188   :  { %v1847_v23 = vpop.f32.mrb[12].mxu1 }
0x1189   :  { %v1851_v25 = vadd.f32 %v1847_v23, %v186_v22  ;;  %v2784_v26 = vpop.f32.mrb[13].mxu1 }
0x118b   :  { %v1852_v27 = vmul.f32 %v1851_v25, %v3190_v18 }
0x118d   :  { %3078 = vtanh.f32 %v1852_v27 }
0x1190   :  { %v1755_v28 = vpop.f32.mrb[18].mxu0 }
0x1191   :  { %v3006_v5 = vadd.f32 %v3278_v3, %v1755_v28  ;;  %v2773_v29 = vpop.f32.mrb[19].mxu0 }
0x1193   :  { %v1760_v30 = vmul.f32 %v3006_v5, %v3190_v18 }
0x1195   :  { %3080 = vtanh.f32 %v1760_v30 }
0x1197   :  { %v3079_v32 = vpop.eup %3078 }
0x1198   :  { %v1854_v10 = vmul.f32 %v3079_v32, %v3190_v18 }
0x119a   :  { %v1855_v33 = vadd.f32 %v1854_v10, %v3193_v24 }
0x119c   :  { %1858 = vrot.lane.b32.xlu0 %v1855_v33, %s3129_s26  ;;  %v1856_v39 = vmul.f32 %v1855_v33, %v1602_v8 }
0x119f   :  { %v3081_v52 = vpop.eup %3080 }
0x11a0   :  { %v1762_v34 = vmul.f32 %v3081_v52, %v3190_v18 }
0x11a2   :  { %v1763_v35 = vadd.f32 %v1762_v34, %v3193_v24 }
0x11a4   :  { %1766 = vrot.lane.b32.xlu1 %v1763_v35, %s3129_s26  ;;  %v1764_v43 = vmul.f32 %v1763_v35, %v1510_v12 }
0x120e   :  { %v1859_v47 = vpop.permute.xlu0 %1858 }
0x120f   :  { %v1861_v31 = vmul.f32 %v1859_v47, %v1855_v33 }
0x1211   :  { %1863 = vrot.lane.b32.xlu0 %v1861_v31, %s3130_s27 }
0x1216   :  { %v1767_v36 = vpop.permute.xlu1 %1766 }
0x1217   :  { %v1769_v38 = vmul.f32 %v1767_v36, %v1763_v35 }
0x1219   :  { %1771 = vrot.lane.b32.xlu1 %v1769_v38, %s3130_s27  ;;  %v48_v38 = vld [vmem:[#allocation2 + $0x80] sm:$0xff] }
0x1283   :  { %v1864_v40 = vpop.permute.xlu0 %1863 }
0x1284   :  { %v1866_v41 = vadd.f32 %v1864_v40, %v1856_v39  ;;  %v49_v39 = vld [vmem:[#allocation2 + $0x88] sm:$0xff] }
0x1286   :  { %3082 = vtanh.f32 %v1866_v41 }
0x128b   :  { %v1772_v44 = vpop.permute.xlu1 %1771 }
0x128c   :  { %v1774_v45 = vadd.f32 %v1772_v44, %v1764_v43 }
0x128e   :  { %3084 = vtanh.f32 %v1774_v45 }
0x1290   :  { %v3083_v46 = vpop.eup %3082 }
0x1291   :  { %1869 = vrot.lane.b32.xlu0 %v3083_v46, %s3129_s26  ;;  %v2426_v46 = vld [vmem:[#allocation2 + $0x98] ss:$0 sm:$0xff] }
0x1298   :  { %v3085_v53 = vpop.eup %3084 }
0x1299   :  { %1777 = vrot.lane.b32.xlu1 %v3085_v53, %s3129_s26 }
0x1303   :  { %v1870_v54 = vpop.permute.xlu0 %1869 }
0x1304   :  { %v1872_v56 = vmul.f32 %v1870_v54, %v1855_v33 }
0x1306   :  { %1874 = vrot.lane.b32.xlu0 %v1872_v56, %s3130_s27 }
0x130b   :  { %v1778_v57 = vpop.permute.xlu1 %1777 }
0x130c   :  { %v1780_v48 = vmul.f32 %v1778_v57, %v1763_v35 }
0x130e   :  { %1949 = vrot.lane.b32.xlu1 %v1780_v48, %s3130_s27 }
0x1378   :  { %v1875_v58 = vpop.permute.xlu0 %1874 }
0x1379   :  { %2794 = vmatmul.mubr.msk.f32.vlgmr.msra.gmra.mrb[14].mxu1 %vm194_vm5, %v1875_v58  ;;  %2816 = vmatmul.mubr.msk.f32.vlgmr.msra.gmra.mrb[20].mxu0 %vm194_vm5, %v1875_v58 }
0x137a   :  { %2973 = vmatpush3.bf16.msra.mxu1 %v3250_v55  ;;  %2804 = vmatprep.mubr.msk.f32.mxu1 %vm3126_vm0, %v3127_v1 }
0x137b   :  { %2974 = vmatprep.subr.bf16.mxu1 %v3125_v0  ;;  %2985 = vmatpush3.bf16.msra.mxu0 %v3213_v37  ;;  %v191_v37 = vadd.f32 %v3246_v51, %v3187_v14 }
0x137c   :  { %2986 = vmatprep.subr.bf16.mxu0 %v3125_v0  ;;  %2826 = vmatprep.mubr.msk.f32.mxu0 %vm3126_vm0, %v3127_v1 }
0x137e   :  { %2976 = vmatpush3.bf16.msra.mxu1 %v3255_v59 }
0x137f   :  { %2988 = vmatpush3.bf16.msra.mxu0 %v3223_v42  ;;  %2995 = vmatprep.subr.bf16.mxu1 %v3125_v0 }
0x1380   :  { %v1950_v49 = vpop.permute.xlu1 %1949  ;;  %2989 = vmatprep.subr.bf16.mxu0 %v3125_v0 }
0x1381   :  { %2805 = vmatmul.mubr.msk.f32.vlgmr.msra.gmra.mrb[14].mxu1 %vm194_vm5, %v1950_v49 }
0x1382   :  { %2848 = vmatprep.mubr.msk.f32.mxu1 %vm3126_vm0, %v3127_v1 }
0x144c   :  { %v2111_v60 = vpop.f32.mrb[20].mxu0 }
0x144d   :  { %v2115_v61 = vadd.f32 %v2111_v60, %v191_v37  ;;  %v2817_v62 = vpop.f32.mrb[21].mxu0 }
0x144f   :  { %v2116_v63 = vmul.f32 %v2115_v61, %v3190_v18 }
0x1451   :  { %3086 = vtanh.f32 %v2116_v63 }
0x1454   :  { %v2019_v42 = vpop.f32.mrb[14].mxu1 }
0x1455   :  { %v3007_v2 = vadd.f32 %v3278_v3, %v2019_v42  ;;  %v2806_v4 = vpop.f32.mrb[15].mxu1 }
0x1457   :  { %v2024_v6 = vmul.f32 %v3007_v2, %v3190_v18 }
0x1459   :  { %3088 = vtanh.f32 %v2024_v6 }
0x145b   :  { %v3087_v7 = vpop.eup %3086 }
0x145c   :  { %v2118_v8 = vmul.f32 %v3087_v7, %v3190_v18 }
0x145e   :  { %v2119_v9 = vadd.f32 %v2118_v8, %v3193_v24 }
0x1460   :  { %2122 = vrot.lane.b32.xlu0 %v2119_v9, %s3129_s26  ;;  %v2120_v17 = vmul.f32 %v2119_v9, %v1866_v41  ;;  %v50_v41 = vld [vmem:[#allocation2 + $0x90] sm:$0xff] }
0x1461   :  { %v2999_v43 = vpack.c.bf16 %v50_v41, %v49_v39 }
0x1463   :  { %v3089_v14 = vpop.eup %3088 }
0x1464   :  { %v2026_v51 = vmul.f32 %v3089_v14, %v3190_v18 }
0x1466   :  { %v2027_v11 = vadd.f32 %v2026_v51, %v3193_v24 }
0x1468   :  { %2030 = vrot.lane.b32.xlu1 %v2027_v11, %s3129_s26  ;;  %v2028_v20 = vmul.f32 %v2027_v11, %v1774_v45 }
0x14d2   :  { %v2123_v12 = vpop.permute.xlu0 %2122 }
0x14d3   :  { %v2125_v13 = vmul.f32 %v2123_v12, %v2119_v9 }
0x14d5   :  { %2127 = vrot.lane.b32.xlu0 %v2125_v13, %s3130_s27 }
0x14da   :  { %v2031_v15 = vpop.permute.xlu1 %2030 }
0x14db   :  { %v2033_v16 = vmul.f32 %v2031_v15, %v2027_v11 }
0x14dd   :  { %2035 = vrot.lane.b32.xlu1 %v2033_v16, %s3130_s27 }
0x1547   :  { %v2128_v50 = vpop.permute.xlu0 %2127 }
0x1548   :  { %v2130_v19 = vadd.f32 %v2128_v50, %v2120_v17 }
0x154a   :  { %3090 = vtanh.f32 %v2130_v19 }
0x154f   :  { %v2036_v21 = vpop.permute.xlu1 %2035 }
0x1550   :  { %v2038_v22 = vadd.f32 %v2036_v21, %v2028_v20 }
0x1552   :  { %3092 = vtanh.f32 %v2038_v22 }
0x1554   :  { %v3091_v23 = vpop.eup %3090 }
0x1555   :  { %2133 = vrot.lane.b32.xlu0 %v3091_v23, %s3129_s26 }
0x155c   :  { %v3093_v25 = vpop.eup %3092 }
0x155d   :  { %2041 = vrot.lane.b32.xlu1 %v3093_v25, %s3129_s26 }
0x15c7   :  { %v2134_v26 = vpop.permute.xlu0 %2133 }
0x15c8   :  { %v2136_v27 = vmul.f32 %v2134_v26, %v2119_v9 }
0x15ca   :  { %2138 = vrot.lane.b32.xlu0 %v2136_v27, %s3130_s27 }
0x15cf   :  { %v2042_v28 = vpop.permute.xlu1 %2041 }
0x15d0   :  { %v2044_v5 = vmul.f32 %v2042_v28, %v2027_v11 }
0x15d2   :  { %2213 = vrot.lane.b32.xlu1 %v2044_v5, %s3130_s27 }
0x163c   :  { %v2139_v29 = vpop.permute.xlu0 %2138 }
0x163d   :  { %2827 = vmatmul.mubr.msk.f32.vlgmr.msra.gmra.mrb[22].mxu0 %vm194_vm5, %v2139_v29 }
0x163e   :  { %2991 = vmatpush3.bf16.msra.mxu0 %v3250_v55  ;;  %2837 = vmatprep.mubr.msk.f32.mxu0 %vm3126_vm0, %v3127_v1 }
0x163f   :  { %2992 = vmatprep.subr.bf16.mxu0 %v3125_v0 }
0x1642   :  { %2994 = vmatpush3.bf16.msra.mxu0 %v3255_v59 }
0x1644   :  { %v2214_v30 = vpop.permute.xlu1 %2213 }
0x1645   :  { %2838 = vmatmul.mubr.msk.f32.vlgmr.msra.gmra.mrb[22].mxu0 %vm194_vm5, %v2214_v30 }
0x1718   :  { %v2283_v32 = vpop.f32.mrb[22].mxu0 }
0x1719   :  { %v3008_v10 = vadd.f32 %v3278_v3, %v2283_v32  ;;  %v2839_v33 = vpop.f32.mrb[23].mxu0  ;;  %v47_v3 = vld [vmem:[#allocation2 + $0x78] sm:$0xff] }
0x171a   :  { %v2996_v40 = vpack.c.bf16 %v48_v38, %v47_v3 }
0x171b   :  { %v2288_v52 = vmul.f32 %v3008_v10, %v3190_v18 }
0x171c   :  { %2997 = vmatpush3.bf16.msra.mxu1 %v2996_v40 }
0x171d   :  { %3094 = vtanh.f32 %v2288_v52  ;;  %2998 = vmatprep.subr.bf16.mxu1 %v3125_v0 }
0x1720   :  { %3000 = vmatpush3.bf16.msra.mxu1 %v2999_v43 }
0x1727   :  { %v3095_v34 = vpop.eup %3094 }
0x1728   :  { %v2290_v55 = vmul.f32 %v3095_v34, %v3190_v18 }
0x172a   :  { %v2291_v35 = vadd.f32 %v2290_v55, %v3193_v24 }
0x172c   :  { %2294 = vrot.lane.b32.xlu0 %v2291_v35, %s3129_s26  ;;  %v2292_v59 = vmul.f32 %v2291_v35, %v2038_v22 }
0x179e   :  { %v2295_v1 = vpop.permute.xlu0 %2294 }
0x179f   :  { %v2297_v47 = vmul.f32 %v2295_v1, %v2291_v35 }
0x17a1   :  { %2299 = vrot.lane.b32.xlu1 %v2297_v47, %s3130_s27 }
0x1813   :  { %v2300_v31 = vpop.permute.xlu1 %2299 }
0x1814   :  { %v2302_v36 = vadd.f32 %v2300_v31, %v2292_v59 }
0x1816   :  { %3096 = vtanh.f32 %v2302_v36 }
0x1820   :  { %v3097_v18 = vpop.eup %3096 }
0x1821   :  { %2305 = vrot.lane.b32.xlu0 %v3097_v18, %s3129_s26 }
0x1893   :  { %v2306_v24 = vpop.permute.xlu0 %2305 }
0x1894   :  { %v2308_v44 = vmul.f32 %v2306_v24, %v2291_v35 }
0x1896   :  { %2314 = vrot.lane.b32.xlu1 %v2308_v44, %s3130_s27 }
0x1908   :  { %v2315_v45 = vpop.permute.xlu1 %2314 }
0x1909   :  { %2849 = vmatmul.mubr.msk.f32.vlgmr.msra.gmra.mrb[16].mxu1 %vm194_vm5, %v2315_v45 }
0x19dc   :  { %v2384_v53 = vpop.f32.mrb[16].mxu1 }
0x19dd   :  { %v2385_v54 = vadd.f32 %v2426_v46, %v2384_v53  ;;  %v2850_v56 = vpop.f32.mrb[17].mxu1 }
0x19df   :  { %2388 = vst [vmem:[%s3541_s2] sm:$0xff] %v2385_v54 }
0x19e0   :  { %2393 = vsyncpa [#allocation3], 1 }

</bundles_post_ra>
